<compile_context>
chip_gen: v5e
topology: v5e:2x2
jax: 0.10.0
libtpu: 0.0.40
codegen_flags: <defaults>
</compile_context>

<pallas_src>
import jax
import jax.numpy as jnp
from jax.experimental import pallas as pl
from jax.experimental.pallas import tpu as pltpu


def _gate_kernel(x_ref, w_ref, b_ref, s_ref, o_ref):
    # Packed Linear: (tile, 128) @ (128, 8n) + (1, 8n).  The block-diagonal
    # weight makes lane segment j of output row r equal logits of batch row
    # 8r + j.
    logits = jnp.dot(
        x_ref[...],
        w_ref[...],
        preferred_element_type=jnp.float32,
        precision=jax.lax.Precision.HIGHEST,
    ) + b_ref[...]

    # Numerically stable softmax per n-wide lane segment.  Subtracting the
    # per-packed-row max (a constant within each segment) leaves the softmax
    # value unchanged; it only differs from a per-segment max when 8
    # consecutive rows have logit spreads > ~80, which a 16-feature gate never
    # produces.
    m = jnp.max(logits, axis=-1, keepdims=True)
    e = jnp.exp(logits - m)

    # Per-segment sums broadcast back over each segment via a tiny resident
    # block-of-ones matmul (row-independent, so padded/garbage rows in a
    # partial tile cannot contaminate valid rows).
    denom = jnp.dot(
        e,
        s_ref[...],
        preferred_element_type=jnp.float32,
        precision=jax.lax.Precision.HIGHEST,
    )
    o_ref[...] = (e / denom).astype(o_ref.dtype)


def _pick_tile(T, *, target_steps=8, min_tile=64, max_tile=1024):
    """Packed-row tile: multiple of 8 sublanes, sized for >= target grid steps."""
    if T <= min_tile:
        return T  # full extent (allowed even if not a multiple of 8)
    t = min(max_tile, max(min_tile, pl.cdiv(T, target_steps)))
    return max(8, (t // 8) * 8)


def gate_forward(x, weight_t, bias):
    """x: (B, 16) f32, weight_t: (16, n) f32, bias: (n,) f32 -> (B, 1, n) f32."""
    B, in_f = x.shape
    n = weight_t.shape[1]
    assert 128 % in_f == 0, "in_features must divide 128 for lane packing"
    pack = 128 // in_f  # 8 batch rows per 128-lane packed row
    f32 = jnp.float32

    # Pad the batch to a multiple of `pack`; padded rows are sliced off below.
    B_pad = pl.cdiv(B, pack) * pack
    if B_pad != B:
        x = jnp.pad(x, ((0, B_pad - B), (0, 0)))
    T = B_pad // pack

    # Lane-dense input view + host-built packed parameters.
    x_packed = x.reshape(T, pack * in_f).astype(f32)                       # (T, 128)
    w_block = jnp.kron(jnp.eye(pack, dtype=f32), weight_t.astype(f32))     # (128, 8n)
    b_block = jnp.tile(bias.reshape(1, n).astype(f32), (1, pack))          # (1, 8n)
    seg_sum = jnp.kron(jnp.eye(pack, dtype=f32), jnp.ones((n, n), f32))    # (8n, 8n)

    tile = _pick_tile(T)
    grid = (pl.cdiv(T, tile),)

    out_packed = pl.pallas_call(
        _gate_kernel,
        out_shape=jax.ShapeDtypeStruct((T, pack * n), f32),
        grid_spec=pltpu.PrefetchScalarGridSpec(
            num_scalar_prefetch=0,
            grid=grid,
            in_specs=[
                # x: one packed batch tile per grid step (double-buffered).
                pl.BlockSpec((tile, pack * in_f), lambda i: (i, 0)),
                # weight / bias / segment-sum: same block every step -> resident.
                pl.BlockSpec((pack * in_f, pack * n), lambda i: (0, 0)),
                pl.BlockSpec((1, pack * n), lambda i: (0, 0)),
                pl.BlockSpec((pack * n, pack * n), lambda i: (0, 0)),
            ],
            out_specs=pl.BlockSpec((tile, pack * n), lambda i: (i, 0)),
        ),
        compiler_params=pltpu.CompilerParams(
            # Batch tiles are independent -> shard across TCs on v7x megacore.
            dimension_semantics=("parallel",),
            # A few MiB of tiles + resident params; fits every generation.
            vmem_limit_bytes=32 * 1024 * 1024,
        ),
    )(x_packed, w_block, b_block, seg_sum)

    # Free row-major unpack: (T, 8n) -> (B_pad, n) -> (B, 1, n).
    return out_packed.reshape(B_pad, n)[:B].reshape(-1, 1, n)


def _reference(x, weight_t, bias):
    logits = jnp.dot(x, weight_t, precision=jax.lax.Precision.HIGHEST) + bias.reshape(1, -1)
    z = jax.nn.softmax(logits, axis=1)
    return z.reshape(-1, 1, weight_t.shape[1])


def _check(B, in_f, n, key):
    kx, kw, kb = jax.random.split(key, 3)
    x = jax.random.normal(kx, (B, in_f), dtype=jnp.float32)
    bound = 1.0 / (in_f ** 0.5)
    weight_t = jax.random.uniform(kw, (in_f, n), jnp.float32, -bound, bound)
    bias = jax.random.uniform(kb, (n,), jnp.float32, -bound, bound)

    z = gate_forward(x, weight_t, bias)
    jax.block_until_ready(z)

    z_ref = _reference(x, weight_t, bias)
    assert z.shape == (B, 1, n), z.shape
    max_err = float(jnp.max(jnp.abs(z - z_ref)))
    assert jnp.allclose(z, z_ref, atol=1e-4, rtol=1e-4), (
        f"mismatch vs reference (max abs err = {max_err:e})")
    assert jnp.allclose(jnp.sum(z, axis=-1), 1.0, atol=1e-3), "rows do not sum to 1"


if __name__ == "__main__":
    IN_F = 16   # Linear in_features (fixed by the module)
    N = 32      # gate size n
    key = jax.random.PRNGKey(0)
    k0, k1 = jax.random.split(key)

    # Small functional check (single packed tile, batch a multiple of the pack factor).
    _check(B=16, in_f=IN_F, n=N, key=k0)
    # Ragged-batch check: exercises the pad/slice path.
    _check(B=10, in_f=IN_F, n=N, key=k1)

    print("KERNEL_OK")
</pallas_src>

<mosaic_0001>
module attributes {stable_mosaic.version = 11 : i64} {
  func.func @_gate_kernel(%arg0: i32, %arg1: memref<2x128xf32, #tpu.memory_space<vmem>>, %arg2: memref<128x256xf32, #tpu.memory_space<vmem>>, %arg3: memref<1x256xf32, #tpu.memory_space<vmem>>, %arg4: memref<256x256xf32, #tpu.memory_space<vmem>>, %arg5: memref<2x256xf32, #tpu.memory_space<vmem>>) attributes {dimension_semantics = [#tpu.dimension_semantics<parallel>], iteration_bounds = array<i64: 1>, scalar_prefetch = 0 : i64, scratch_operands = 0 : i64, tpu.core_type = #tpu.core_type<tc>, window_params = [{transform_indices = @transform_0, window_bounds = array<i64: 2, 128>}, {pipeline_mode = #tpu.pipeline_mode<synchronous>, transform_indices = @transform_1, window_bounds = array<i64: 128, 256>}, {pipeline_mode = #tpu.pipeline_mode<synchronous>, transform_indices = @transform_2, window_bounds = array<i64: 1, 256>}, {pipeline_mode = #tpu.pipeline_mode<synchronous>, transform_indices = @transform_3, window_bounds = array<i64: 256, 256>}, {transform_indices = @transform_4, window_bounds = array<i64: 2, 256>}]} {
    %c0 = arith.constant 0 : index
    %c0_0 = arith.constant 0 : index
    %0 = vector.load %arg1[%c0, %c0_0] : memref<2x128xf32, #tpu.memory_space<vmem>>, vector<2x128xf32>
    %c0_1 = arith.constant 0 : index
    %c0_2 = arith.constant 0 : index
    %1 = vector.load %arg2[%c0_1, %c0_2] : memref<128x256xf32, #tpu.memory_space<vmem>>, vector<128x256xf32>
    %cst = arith.constant dense<0.000000e+00> : vector<2x256xf32>
    %2 = tpu.matmul %0, %1, %cst {dimension_numbers = #tpu.dot_dimension_numbers<[1], [0], [0], [1], [0, 0, 1, 1], [], []>, precision = #tpu.contract_precision<fp32>} : vector<2x128xf32>, vector<128x256xf32>, vector<2x256xf32> -> vector<2x256xf32>
    %c0_3 = arith.constant 0 : index
    %c0_4 = arith.constant 0 : index
    %3 = vector.load %arg3[%c0_3, %c0_4] : memref<1x256xf32, #tpu.memory_space<vmem>>, vector<1x256xf32>
    %4 = vector.broadcast %3 : vector<1x256xf32> to vector<2x256xf32>
    %5 = arith.addf %2, %4 : vector<2x256xf32>
    %cst_5 = arith.constant dense<0xFF800000> : vector<2xf32>
    %6 = vector.multi_reduction <maximumf>, %5, %cst_5 [1] : vector<2x256xf32> to vector<2xf32>
    %7 = vector.shape_cast %6 : vector<2xf32> to vector<2x1xf32>
    %8 = vector.broadcast %7 : vector<2x1xf32> to vector<2x256xf32>
    %9 = arith.subf %5, %8 : vector<2x256xf32>
    %10 = math.exp %9 : vector<2x256xf32>
    %c0_6 = arith.constant 0 : index
    %c0_7 = arith.constant 0 : index
    %11 = vector.load %arg4[%c0_6, %c0_7] : memref<256x256xf32, #tpu.memory_space<vmem>>, vector<256x256xf32>
    %cst_8 = arith.constant dense<0.000000e+00> : vector<2x256xf32>
    %12 = tpu.matmul %10, %11, %cst_8 {dimension_numbers = #tpu.dot_dimension_numbers<[1], [0], [0], [1], [0, 0, 1, 1], [], []>, precision = #tpu.contract_precision<fp32>} : vector<2x256xf32>, vector<256x256xf32>, vector<2x256xf32> -> vector<2x256xf32>
    %13 = arith.divf %10, %12 : vector<2x256xf32>
    %c0_9 = arith.constant 0 : index
    %c0_10 = arith.constant 0 : index
    %14 = vector.load %arg5[%c0_9, %c0_10] : memref<2x256xf32, #tpu.memory_space<vmem>>, vector<2x256xf32>
    tpu.vector_store %arg5[%c0_9, %c0_10], %13 {strides = array<i32>} : memref<2x256xf32, #tpu.memory_space<vmem>>, vector<2x256xf32>,
    return
  }
  func.func @transform_0(%arg0: i32) -> (i32, i32) {
    %c0_i32 = arith.constant 0 : i32
    %c0_i32_0 = arith.constant 0 : i32
    return %arg0, %c0_i32 : i32, i32
  }
  func.func @transform_1(%arg0: i32) -> (i32, i32) {
    %c0_i32 = arith.constant 0 : i32
    %c0_i32_0 = arith.constant 0 : i32
    %c0_i32_1 = arith.constant 0 : i32
    return %c0_i32, %c0_i32_0 : i32, i32
  }
  func.func @transform_2(%arg0: i32) -> (i32, i32) {
    %c0_i32 = arith.constant 0 : i32
    %c0_i32_0 = arith.constant 0 : i32
    %c0_i32_1 = arith.constant 0 : i32
    return %c0_i32, %c0_i32_0 : i32, i32
  }
  func.func @transform_3(%arg0: i32) -> (i32, i32) {
    %c0_i32 = arith.constant 0 : i32
    %c0_i32_0 = arith.constant 0 : i32
    %c0_i32_1 = arith.constant 0 : i32
    return %c0_i32, %c0_i32_0 : i32, i32
  }
  func.func @transform_4(%arg0: i32) -> (i32, i32) {
    %c0_i32 = arith.constant 0 : i32
    %c0_i32_0 = arith.constant 0 : i32
    return %arg0, %c0_i32 : i32, i32
  }
}

</mosaic_0001>

<bundles_post_ra>
// kernel: tpu_custom_call.1
= control target key start
LH: loop header
LB: loop body
LE: loop exit
PB: predicated region body
PF: predicated region fallthrough
CT: control target
= control target key end

     0   :  { %9 = vsyncpa [#allocation3], 0  ;;  %s4016_s0 = inlined_call_operand.hbm [shape: f32[2,128], index: 0, kind: input, shape index: {}]   ;;  %s4017_s1 = inlined_call_operand.hbm [shape: f32[128,256], index: 1, kind: input, shape index: {}]   ;;  %s4018_s2 = inlined_call_operand.hbm [shape: f32[1,256], index: 2, kind: input, shape index: {}]   ;;  %s4019_s3 = inlined_call_operand.hbm [shape: f32[256,256], index: 3, kind: input, shape index: {}]   ;;  %s4020_s4 = inlined_call_operand.hbm [shape: f32[2,256], index: 4, kind: output, shape index: {}]  }
   0x1   :  { %10 = vsyncpa [#allocation6], 0 }
   0x2   :  { %11 = vsyncpa [#allocation9], 0  ;;  %s28_s17 = sshll.u32 %s4017_s1, 4  ;;  %s29_s17 = int_to_ptr.hbm [resolvable:$true] %s28_s17 }
   0x3   :  { %12 = vsyncpa [#allocation4], 0  ;;  %s2436_s18 = smov [#allocation5]   ;;  %s18_s22 = sshll.u32 %s4016_s0, 4  ;;  %s19_s22 = int_to_ptr.hbm [resolvable:$true] %s18_s22 }
   0x4   :  { %s30_s19 = sshll.u32 %s2436_s18, 4  ;;  %s2437_s23 = smov 256   ;;  %s31_s19 = int_to_ptr.vmem [resolvable:$true] %s30_s19 }
   0x5   :  { %s2438_s24 = smov 16   ;;  %s2439_s25 = smov [#allocation2]  }
   0x6   :  { %36 = dma.hbm_to_vmem [thread:$0]  %s29_s17, 4096, %s31_s19, [#allocation6], %s2437_s23, %s2437_s23, %s2438_s24  }
   0x7   :  { %s20_s26 = sshll.u32 %s2439_s25, 4  ;;  %s42_s29 = sshll.u32 %s4018_s2, 4  ;;  %s21_s26 = int_to_ptr.vmem [resolvable:$true] %s20_s26  ;;  %s43_s29 = int_to_ptr.hbm [resolvable:$true] %s42_s29 }
   0x8   :  { %23 = dma.hbm_to_vmem [thread:$0]  %s19_s22, 32, %s21_s26, [#allocation3]  }
   0x9   :  { %s52_s5 = sshll.u32 %s4019_s3, 4  ;;  %s2440_s6 = smov [#allocation7]   ;;  %s53_s5 = int_to_ptr.hbm [resolvable:$true] %s52_s5 }
   0xa   :  { %s44_s7 = sshll.u32 %s2440_s6, 4  ;;  %s2441_s0 = smov [#allocation8]   ;;  %s45_s7 = int_to_ptr.vmem [resolvable:$true] %s44_s7 }
   0xb   :  { %47 = dma.hbm_to_vmem [thread:$0]  %s43_s29, 32, %s45_s7, [#allocation6]  }
   0xc   :  { %s54_s8 = sshll.u32 %s2441_s0, 4  ;;  %s55_s8 = int_to_ptr.vmem [resolvable:$true] %s54_s8 }
   0xd   :  { %60 = dma.hbm_to_vmem [thread:$0]  %s53_s5, 8192, %s55_s8, [#allocation9], %s2437_s23, %s2437_s23, %s2438_s24  }
   0xe   :  { %2428 = dma.done.wait [#allocation3], 32  }
   0xf   :  { %2429 = vsyncadd [#allocation3], 4294967264 }
  0x10   :  { %2430 = dma.done.wait [#allocation6], 4128  }
  0x11   :  { %2431 = vsyncadd [#allocation6], 4294963168 }
  0x12   :  { %2432 = dma.done.wait [#allocation9], 8192  }
  0x13   :  { %2433 = vsyncadd [#allocation9], 4294959104  ;;  %v108_v0 = vld [vmem:[#allocation5 + $0xf0] sm:$0xff]  ;;  %v106_v1 = vld [vmem:[#allocation5 + $0xe0] sm:$0xff]  ;;  %vm798_vm0 = vcmask 1041408   ;;  %s2442_s2 = smov [#allocation10]  }
  0x14   :  { %v104_v2 = vld [vmem:[#allocation5 + $0xd0] sm:$0xff]  ;;  %v2480_v3 = vand.u32 4294901760, %v108_v0  ;;  %v2482_v4 = vand.u32 4294901760, %v106_v1  ;;  %v102_v6 = vld [vmem:[#allocation5 + $0xc0] sm:$0xff]  ;;  %v109_v60 = vld [vmem:[#allocation5 + $0xf8] sm:$0xff]  ;;  %s2279_s3 = sshll.u32 %s2442_s2, 4  ;;  %s2280_s3 = int_to_ptr.vmem [resolvable:$true] %s2279_s3 }
  0x15   :  { %v2484_v5 = vand.u32 4294901760, %v104_v2  ;;  %v100_v7 = vld [vmem:[#allocation5 + $0xb0] sm:$0xff]  ;;  %v98_v8 = vld [vmem:[#allocation5 + $0xa0] sm:$0xff]  ;;  %v2486_v9 = vand.u32 4294901760, %v102_v6  ;;  %v107_v63 = vld [vmem:[#allocation5 + $0xe8] sm:$0xff]  ;;  %s2281_s11 = sshll.u32 %s4020_s4, 4  ;;  %s2282_s11 = int_to_ptr.hbm [resolvable:$true] %s2281_s11 }
  0x16   :  { %v2488_v10 = vand.u32 4294901760, %v100_v7  ;;  %v2490_v11 = vand.u32 4294901760, %v98_v8  ;;  %v96_v12 = vld [vmem:[#allocation5 + $0x90] sm:$0xff]  ;;  %v94_v13 = vld [vmem:[#allocation5 + $0x80] sm:$0xff]  ;;  %v2493_v14 = vsub.f32 %v108_v0, %v2480_v3  ;;  %117 = vmatpush.msra.mxu0 %v2480_v3  ;;  %v2497_v15 = vsub.f32 %v106_v1, %v2482_v4  ;;  %313 = vmatpush.msra.mxu3 %v2480_v3 }
  0x17   :  { %v2501_v16 = vsub.f32 %v104_v2, %v2484_v5  ;;  %v2503_v17 = vand.u32 4294901760, %v96_v12  ;;  %v2506_v18 = vsub.f32 %v102_v6, %v2486_v9  ;;  %v2519_v24 = vand.u32 4294901760, %v94_v13  ;;  %v92_v25 = vld [vmem:[#allocation5 + $0x70] sm:$0xff]  ;;  %v90_v34 = vld [vmem:[#allocation5 + $0x60] sm:$0xff] }
  0x18   :  { %v2509_v19 = vsub.f32 %v100_v7, %v2488_v10  ;;  %v2512_v20 = vsub.f32 %v98_v8, %v2490_v11  ;;  %260 = vmatpush.msra.mxu2 %v2493_v14  ;;  %119 = vmatpush.msra.mxu0 %v2482_v4  ;;  %v4035_v21 = vand.u32 4294901760, %v2493_v14  ;;  %v4034_v22 = vand.u32 4294901760, %v2497_v15  ;;  %v88_v35 = vld [vmem:[#allocation5 + $0x50] sm:$0xff]  ;;  %v86_v40 = vld [vmem:[#allocation5 + $0x40] sm:$0xff] }
  0x19   :  { %v4033_v23 = vand.u32 4294901760, %v2501_v16  ;;  %315 = vmatpush.msra.mxu3 %v2482_v4  ;;  %v4030_v26 = vand.u32 4294901760, %v2506_v18  ;;  %v2524_v27 = vsub.f32 %v96_v12, %v2503_v17  ;;  %v2540_v33 = vand.u32 4294901760, %v92_v25  ;;  %v84_v48 = vld [vmem:[#allocation5 + $0x30] sm:$0xff]  ;;  %v82_v53 = vld [vmem:[#allocation5 + $0x20] sm:$0xff] }
  0x1a   :  { %263 = vmatpush.msra.mxu2 %v2497_v15  ;;  %v160_v28 = vsub.f32 %v2493_v14, %v4035_v21  ;;  %121 = vmatpush.msra.mxu0 %v2484_v5  ;;  %v166_v29 = vsub.f32 %v2497_v15, %v4034_v22  ;;  %v4029_v31 = vand.u32 4294901760, %v2509_v19  ;;  %v4027_v32 = vand.u32 4294901760, %v2512_v20  ;;  %v80_v59 = vld [vmem:[#allocation5 + $0x10] sm:$0xff]  ;;  %v78_v6 = vld [vmem:[#allocation5] sm:$0xff] }
  0x1b   :  { %v172_v30 = vsub.f32 %v2501_v16, %v4033_v23  ;;  %317 = vmatpush.msra.mxu3 %v2484_v5  ;;  %v178_v38 = vsub.f32 %v2506_v18, %v4030_v26  ;;  %v2548_v39 = vsub.f32 %v94_v13, %v2519_v24  ;;  %v4026_v41 = vand.u32 4294901760, %v2524_v27  ;;  %v105_v13 = vld [vmem:[#allocation5 + $0xd8] sm:$0xff] }
  0x1c   :  { %v161_v36 = vand.u32 4294901760, %v160_v28  ;;  %266 = vmatpush.msra.mxu2 %v2501_v16  ;;  %v167_v37 = vand.u32 4294901760, %v166_v29  ;;  %123 = vmatpush.msra.mxu0 %v2486_v9  ;;  %v2553_v42 = vsub.f32 %v92_v25, %v2540_v33  ;;  %v184_v44 = vsub.f32 %v2509_v19, %v4029_v31  ;;  %v93_v26 = vld [vmem:[#allocation5 + $0x78] sm:$0xff] }
  0x1d   :  { %319 = vmatpush.msra.mxu3 %v2486_v9  ;;  %v173_v43 = vand.u32 4294901760, %v172_v30  ;;  %v2559_v45 = vand.u32 4294901760, %v90_v34  ;;  %v2561_v46 = vand.u32 4294901760, %v88_v35  ;;  %v2565_v47 = vand.u32 4294901760, %v86_v40 }
  0x1e   :  { %162 = vmatpush.msra.mxu1 %v161_v36  ;;  %269 = vmatpush.msra.mxu2 %v2506_v18  ;;  %v179_v49 = vand.u32 4294901760, %v178_v38  ;;  %v190_v50 = vsub.f32 %v2512_v20, %v4027_v32  ;;  %v4025_v51 = vand.u32 4294901760, %v2548_v39  ;;  %v4024_v54 = vand.u32 4294901760, %v2553_v42  ;;  %v95_v32 = vld [vmem:[#allocation5 + $0x88] sm:$0xff] }
  0x1f   :  { %125 = vmatpush.msra.mxu0 %v2488_v10  ;;  %321 = vmatpush.msra.mxu3 %v2488_v10  ;;  %v2573_v52 = vsub.f32 %v90_v34, %v2559_v45  ;;  %v185_v55 = vand.u32 4294901760, %v184_v44  ;;  %v196_v56 = vsub.f32 %v2524_v27, %v4026_v41  ;;  %v2583_v57 = vsub.f32 %v88_v35, %v2561_v46 }
  0x20   :  { %168 = vmatpush.msra.mxu1 %v167_v37  ;;  %272 = vmatpush.msra.mxu2 %v2509_v19  ;;  %v2585_v58 = vand.u32 4294901760, %v84_v48  ;;  %v2590_v61 = vsub.f32 %v86_v40, %v2565_v47  ;;  %v2592_v62 = vand.u32 4294901760, %v82_v53  ;;  %v191_v0 = vand.u32 4294901760, %v190_v50  ;;  %v103_v37 = vld [vmem:[#allocation5 + $0xc8] sm:$0xff]  ;;  %v101_v50 = vld [vmem:[#allocation5 + $0xb8] sm:$0xff] }
  0x21   :  { %127 = vmatpush.msra.mxu0 %v2490_v11  ;;  %323 = vmatpush.msra.mxu3 %v2490_v11  ;;  %v202_v1 = vsub.f32 %v2548_v39, %v4025_v51  ;;  %v4022_v2 = vand.u32 4294901760, %v2573_v52  ;;  %v208_v7 = vsub.f32 %v2553_v42, %v4024_v54  ;;  %v2604_v8 = vand.u32 4294901760, %v80_v59 }
  0x22   :  { %174 = vmatpush.msra.mxu1 %v173_v43  ;;  %275 = vmatpush.msra.mxu2 %v2512_v20  ;;  %v2606_v12 = vand.u32 4294901760, %v109_v60  ;;  %v197_v25 = vand.u32 4294901760, %v196_v56  ;;  %v4021_v28 = vand.u32 4294901760, %v2583_v57  ;;  %v2611_v29 = vsub.f32 %v84_v48, %v2585_v58 }
  0x23   :  { %129 = vmatpush.msra.mxu0 %v2503_v17  ;;  %325 = vmatpush.msra.mxu3 %v2503_v17  ;;  %4100 = vst [vmem:[#allocation15_spill] sm:$0xff] %v2604_v8  ;;  %v2613_v30 = vand.u32 4294901760, %v107_v63  ;;  %v4023_v34 = vand.u32 4294901760, %v2590_v61  ;;  %v2619_v35 = vsub.f32 %v82_v53, %v2592_v62  ;;  %v2621_v36 = vand.u32 4294901760, %v78_v6 }
  0x24   :  { %180 = vmatpush.msra.mxu1 %v179_v49  ;;  %278 = vmatpush.msra.mxu2 %v2524_v27  ;;  %4101 = vst [vmem:[#allocation16_spill] sm:$0xff] %v2606_v12  ;;  %v203_v38 = vand.u32 4294901760, %v202_v1  ;;  %v214_v40 = vsub.f32 %v2573_v52, %v4022_v2  ;;  %v2628_v43 = vsub.f32 %v109_v60, %v2606_v12  ;;  %v2630_v44 = vand.u32 4294901760, %v105_v13 }
  0x25   :  { %131 = vmatpush.msra.mxu0 %v2519_v24  ;;  %327 = vmatpush.msra.mxu3 %v2519_v24  ;;  %4102 = vst [vmem:[#allocation17_spill] sm:$0xff] %v2621_v36  ;;  %v209_v48 = vand.u32 4294901760, %v208_v7  ;;  %v2635_v49 = vsub.f32 %v80_v59, %v2604_v8  ;;  %v220_v53 = vsub.f32 %v2583_v57, %v4021_v28  ;;  %v2645_v60 = vand.u32 4294901760, %v103_v37 }
  0x26   :  { %186 = vmatpush.msra.mxu1 %v185_v55  ;;  %281 = vmatpush.msra.mxu2 %v2548_v39  ;;  %v4028_v55 = vand.u32 4294901760, %v2611_v29  ;;  %v2643_v56 = vsub.f32 %v107_v63, %v2613_v30  ;;  %v226_v59 = vsub.f32 %v2590_v61, %v4023_v34  ;;  %v4031_v1 = vand.u32 4294901760, %v2619_v35 }
  0x27   :  { %133 = vmatpush.msra.mxu0 %v2540_v33  ;;  %329 = vmatpush.msra.mxu3 %v2540_v33  ;;  %v2654_v7 = vsub.f32 %v78_v6, %v2621_v36  ;;  %v215_v63 = vand.u32 4294901760, %v214_v40  ;;  %v2659_v28 = vsub.f32 %v105_v13, %v2630_v44  ;;  %v2661_v2 = vand.u32 4294901760, %v101_v50  ;;  %v97_v6 = vld [vmem:[#allocation5 + $0x98] sm:$0xff] }
  0x28   :  { %192 = vmatpush.msra.mxu1 %v191_v0  ;;  %284 = vmatpush.msra.mxu2 %v2553_v42  ;;  %4103 = vst [vmem:[#allocation18_spill] sm:$0xff] %v2643_v56  ;;  %v99_v0 = vld [vmem:[#allocation5 + $0xa8] sm:$0xff]  ;;  %v4037_v34 = vand.u32 4294901760, %v2635_v49  ;;  %v232_v13 = vsub.f32 %v2611_v29, %v4028_v55  ;;  %v4036_v40 = vand.u32 4294901760, %v2643_v56  ;;  %v2674_v51 = vsub.f32 %v103_v37, %v2645_v60 }
  0x29   :  { %135 = vmatpush.msra.mxu0 %v2559_v45  ;;  %331 = vmatpush.msra.mxu3 %v2559_v45  ;;  %4104 = vst [vmem:[#allocation19_spill] sm:$0xff] %v2659_v28  ;;  %v2666_v54 = vand.u32 4294901760, %v99_v0  ;;  %v227_v41 = vand.u32 4294901760, %v226_v59  ;;  %v4042_v55 = vand.u32 4294901760, %v2659_v28  ;;  %v2688_v59 = vsub.f32 %v101_v50, %v2661_v2 }
  0x2a   :  { %198 = vmatpush.msra.mxu1 %v197_v25  ;;  %287 = vmatpush.msra.mxu2 %v2573_v52  ;;  %v4032_v25 = vand.u32 4294901760, %v2628_v43  ;;  %4105 = vst [vmem:[#allocation20_spill] sm:$0xff] %v2674_v51  ;;  %v2690_v31 = vand.u32 4294901760, %v97_v6  ;;  %v507_v50 = vsub.f32 %v2643_v56, %v4036_v40  ;;  %v2705_v22 = vand.u32 4294901760, %v95_v32 }
  0x2b   :  { %137 = vmatpush.msra.mxu0 %v2561_v46  ;;  %333 = vmatpush.msra.mxu3 %v2561_v46 }
  0x2c   :  { %204 = vmatpush.msra.mxu1 %v203_v38  ;;  %290 = vmatpush.msra.mxu2 %v2583_v57  ;;  %v221_v38 = vand.u32 4294901760, %v220_v53  ;;  %v4040_v53 = vand.u32 4294901760, %v2654_v7  ;;  %v501_v37 = vsub.f32 %v2628_v43, %v4032_v25  ;;  %v233_v25 = vand.u32 4294901760, %v232_v13  ;;  %v91_v13 = vld [vmem:[#allocation5 + $0x68] sm:$0xff] }
  0x2d   :  { %139 = vmatpush.msra.mxu0 %v2565_v47  ;;  %335 = vmatpush.msra.mxu3 %v2565_v47  ;;  %v2730_v23 = vsub.f32 %v95_v32, %v2705_v22 }
  0x2e   :  { %210 = vmatpush.msra.mxu1 %v209_v48  ;;  %293 = vmatpush.msra.mxu2 %v2590_v61  ;;  %v238_v48 = vsub.f32 %v2619_v35, %v4031_v1  ;;  %v2698_v1 = vsub.f32 %v99_v0, %v2666_v54  ;;  %v250_v0 = vsub.f32 %v2654_v7, %v4040_v53  ;;  %v502_v40 = vand.u32 4294901760, %v501_v37 }
  0x2f   :  { %141 = vmatpush.msra.mxu0 %v2585_v58  ;;  %337 = vmatpush.msra.mxu3 %v2585_v58  ;;  %v508_v37 = vand.u32 4294901760, %v507_v50 }
  0x30   :  { %216 = vmatpush.msra.mxu1 %v215_v63  ;;  %296 = vmatpush.msra.mxu2 %v2611_v29  ;;  %v244_v63 = vsub.f32 %v2635_v49, %v4037_v34  ;;  %v239_v21 = vand.u32 4294901760, %v238_v48  ;;  %v513_v34 = vsub.f32 %v2659_v28, %v4042_v55  ;;  %v2720_v48 = vsub.f32 %v97_v6, %v2690_v31  ;;  %v87_v28 = vld [vmem:[#allocation5 + $0x48] sm:$0xff] }
  0x31   :  { %143 = vmatpush.msra.mxu0 %v2592_v62  ;;  %339 = vmatpush.msra.mxu3 %v2592_v62  ;;  %v2732_v6 = vand.u32 4294901760, %v91_v13  ;;  %v251_v53 = vand.u32 4294901760, %v250_v0 }
  0x32   :  { %222 = vmatpush.msra.mxu1 %v221_v38  ;;  %299 = vmatpush.msra.mxu2 %v2619_v35  ;;  %v2712_v38 = vand.u32 4294901760, %v93_v26  ;;  %v245_v56 = vand.u32 4294901760, %v244_v63  ;;  %v4107_v63 = vand.u32 4294901760, %v2493_v14  ;;  %v514_v50 = vand.u32 4294901760, %v513_v34 }
  0x33   :  { %145 = vmatpush.msra.mxu0 %v2604_v8  ;;  %341 = vmatpush.msra.mxu3 %v2604_v8  ;;  %v4106_v8 = vand.u32 4294901760, %v2674_v51  ;;  %v4109_v14 = vand.u32 4294901760, %v2497_v15  ;;  %v2754_v0 = vsub.f32 %v91_v13, %v2732_v6 }
  0x34   :  { %228 = vmatpush.msra.mxu1 %v227_v41  ;;  %302 = vmatpush.msra.mxu2 %v2635_v49  ;;  %v89_v41 = vld [vmem:[#allocation5 + $0x58] sm:$0xff] }
  0x35   :  { %147 = vmatpush.msra.mxu0 %v2621_v36  ;;  %343 = vmatpush.msra.mxu3 %v2621_v36  ;;  %v519_v55 = vsub.f32 %v2674_v51, %v4106_v8  ;;  %v4108_v8 = vand.u32 4294901760, %v2688_v59  ;;  %v536_v51 = vand.u32 4294901760, %v2720_v48  ;;  %v2744_v36 = vand.u32 4294901760, %v89_v41 }
  0x36   :  { %234 = vmatpush.msra.mxu1 %v233_v25  ;;  %305 = vmatpush.msra.mxu2 %v2654_v7  ;;  %v2738_v25 = vsub.f32 %v93_v26, %v2712_v38  ;;  %v4110_v26 = vand.u32 4294901760, %v2698_v1 }
  0x37   :  { %354 = vmatpush.msrb.mxu0 %v4107_v63  ;;  %503 = vmatpush.msrb.mxu3 %v502_v40  ;;  %v525_v32 = vsub.f32 %v2688_v59, %v4108_v8  ;;  %v520_v34 = vand.u32 4294901760, %v519_v55  ;;  %v4050_v40 = vand.u32 4294901760, %v2730_v23  ;;  %v2756_v63 = vand.u32 4294901760, %v87_v28 }
  0x38   :  { %458 = vmatpush.msrb.mxu2 %v2606_v12  ;;  %240 = vmatpush.msra.mxu1 %v239_v21  ;;  %v85_v12 = vld [vmem:[#allocation5 + $0x38] sm:$0xff]  ;;  %v531_v21 = vsub.f32 %v2698_v1, %v4110_v26  ;;  %v4111_v8 = vand.u32 4294901760, %v2501_v16  ;;  %v4051_v15 = vand.u32 4294901760, %v2738_v25  ;;  %v83_v26 = vld [vmem:[#allocation5 + $0x28] sm:$0xff]  ;;  %v2768_v13 = vsub.f32 %v89_v41, %v2744_v36 }
  0x39   :  { %358 = vmatpush.msrb.mxu0 %v4109_v14  ;;  %509 = vmatpush.msrb.mxu3 %v508_v37  ;;  %v2762_v14 = vand.u32 4294901760, %v85_v12  ;;  %v526_v55 = vand.u32 4294901760, %v525_v32  ;;  %v81_v37 = vld [vmem:[#allocation5 + $0x18] sm:$0xff]  ;;  %v2779_v32 = vsub.f32 %v87_v28, %v2756_v63  ;;  %v2781_v41 = vand.u32 4294901760, %v83_v26 }
  0x3a   :  { %460 = vmatpush.msrb.mxu2 %v2613_v30  ;;  %246 = vmatpush.msra.mxu1 %v245_v56  ;;  %v537_v56 = vsub.f32 %v2720_v48, %v536_v51  ;;  %v532_v16 = vand.u32 4294901760, %v531_v21  ;;  %v4113_v21 = vand.u32 4294901760, %v2509_v19  ;;  %v560_v28 = vand.u32 4294901760, %v2768_v13 }
  0x3b   :  { %362 = vmatpush.msrb.mxu0 %v4111_v8  ;;  %515 = vmatpush.msrb.mxu3 %v514_v50  ;;  %v4112_v8 = vand.u32 4294901760, %v2506_v18  ;;  %v554_v50 = vand.u32 4294901760, %v2754_v0  ;;  %v2789_v18 = vsub.f32 %v85_v12, %v2762_v14 }
  0x3c   :  { %462 = vmatpush.msrb.mxu2 %v2630_v44  ;;  %252 = vmatpush.msra.mxu1 %v251_v53  ;;  %v543_v53 = vsub.f32 %v2730_v23, %v4050_v40  ;;  %v77_v40 = vld [vmem:[#allocation2] sm:$0x3] }
  0x3d   :  { %366 = vmatpush.msrb.mxu0 %v4112_v8  ;;  %521 = vmatpush.msrb.mxu3 %v520_v34  ;;  %v538_v34 = vand.u32 4294901760, %v537_v56  ;;  %v2794_v8 = vand.u32 4294901760, %v81_v37  ;;  %v555_v19 = vsub.f32 %v2754_v0, %v554_v50  ;;  %v2805_v56 = vsub.f32 %v83_v26, %v2781_v41 }
  0x3e   :  { %421 = vmatpush.msrb.mxu1 %v2480_v3  ;;  %464 = vmatpush.msrb.mxu2 %v2645_v60  ;;  %v549_v3 = vsub.f32 %v2738_v25, %v4051_v15  ;;  %v4114_v15 = vand.u32 4294901760, %v2512_v20  ;;  %v544_v12 = vand.u32 4294901760, %v543_v53  ;;  %v4115_v20 = vand.u32 4294901760, %v2524_v27 }
  0x3f   :  { %370 = vmatpush.msrb.mxu0 %v4113_v21  ;;  %527 = vmatpush.msrb.mxu3 %v526_v55  ;;  %v566_v55 = vand.u32 4294901760, %v2779_v32  ;;  %v572_v21 = vand.u32 4294901760, %v2789_v18  ;;  %v2818_v26 = vsub.f32 %v81_v37, %v2794_v8  ;;  %v2820_v53 = vand.u32 4294901760, %v77_v40 }
  0x40   :  { %423 = vmatpush.msrb.mxu1 %v2482_v4  ;;  %466 = vmatpush.msrb.mxu2 %v2661_v2  ;;  %v79_v4 = vld [vmem:[#allocation5 + $0x8] sm:$0xff]  ;;  %v556_v27 = vand.u32 4294901760, %v555_v19  ;;  %v4117_v37 = vand.u32 4294901760, %v2553_v42 }
  0x41   :  { %374 = vmatpush.msrb.mxu0 %v4114_v15  ;;  %533 = vmatpush.msrb.mxu3 %v532_v16  ;;  %v561_v15 = vsub.f32 %v2768_v13, %v560_v28  ;;  %v2815_v16 = vand.u32 4294901760, %v79_v4  ;;  %v2839_v19 = vsub.f32 %v77_v40, %v2820_v53  ;;  %v4119_v40 = vand.u32 4294901760, %v2583_v57 }
  0x42   :  { %425 = vmatpush.msrb.mxu1 %v2484_v5  ;;  %468 = vmatpush.msrb.mxu2 %v2666_v54  ;;  %v550_v5 = vand.u32 4294901760, %v549_v3  ;;  %v567_v3 = vsub.f32 %v2779_v32, %v566_v55 }
  0x43   :  { %378 = vmatpush.msrb.mxu0 %v4115_v20  ;;  %539 = vmatpush.msrb.mxu3 %v538_v34  ;;  %v578_v34 = vand.u32 4294901760, %v2805_v56  ;;  %v2842_v20 = vsub.f32 %v79_v4, %v2815_v16 }
  0x44   :  { %427 = vmatpush.msrb.mxu1 %v2486_v9  ;;  %470 = vmatpush.msrb.mxu2 %v2690_v31  ;;  %v4116_v9 = vand.u32 4294901760, %v2548_v39  ;;  %v562_v39 = vand.u32 4294901760, %v561_v15  ;;  %v568_v42 = vand.u32 4294901760, %v567_v3  ;;  %v2860_v15 = vand.u32 4294901760, %v2839_v19 }
  0x45   :  { %545 = vmatpush.msrb.mxu3 %v544_v12  ;;  %v584_v12 = vand.u32 4294901760, %v2818_v26  ;;  %v590_v4 = vand.u32 4294901760, %v2842_v20  ;;  %308 = vmatmul.f32.vlgmr.msra.gmra.mxu2 %v2839_v19 }
  0x46   :  { %429 = vmatpush.msrb.mxu1 %v2488_v10  ;;  %472 = vmatpush.msrb.mxu2 %v2705_v22  ;;  %v573_v10 = vsub.f32 %v2789_v18, %v572_v21  ;;  %v151_v3 = vsub.f32 %v2839_v19, %v2860_v15 }
  0x47   :  { %382 = vmatpush.msrb.mxu0 %v4116_v9  ;;  %551 = vmatpush.msrb.mxu3 %v550_v5  ;;  %v579_v5 = vsub.f32 %v2805_v56, %v578_v34  ;;  %v4121_v9 = vand.u32 4294901760, %v2611_v29 }
  0x48   :  { %431 = vmatpush.msrb.mxu1 %v2490_v11  ;;  %474 = vmatpush.msrb.mxu2 %v2712_v38  ;;  %v4118_v11 = vand.u32 4294901760, %v2573_v52  ;;  %v585_v52 = vsub.f32 %v2818_v26, %v584_v12 }
  0x49   :  { %386 = vmatpush.msrb.mxu0 %v4117_v37  ;;  %557 = vmatpush.msrb.mxu3 %v556_v27  ;;  %v580_v57 = vand.u32 4294901760, %v579_v5  ;;  %v4129_v37 = vld [vmem:[#allocation16_spill] sm:$0xff] }
  0x4a   :  { %433 = vmatpush.msrb.mxu1 %v2503_v17  ;;  %476 = vmatpush.msrb.mxu2 %v2732_v6  ;;  %v574_v17 = vand.u32 4294901760, %v573_v10  ;;  %v586_v27 = vand.u32 4294901760, %v585_v52  ;;  %v152_v10 = vand.u32 4294901760, %v151_v3  ;;  %v820_v3 = vld [vmem:[#allocation8 + $0x50] sm:$0xff] }
  0x4b   :  { %390 = vmatpush.msrb.mxu0 %v4118_v11  ;;  %563 = vmatpush.msrb.mxu3 %v562_v39 }
  0x4c   :  { %435 = vmatpush.msrb.mxu1 %v2519_v24  ;;  %478 = vmatpush.msrb.mxu2 %v2744_v36  ;;  %v4120_v24 = vand.u32 4294901760, %v2590_v61  ;;  %v4123_v61 = vand.u32 4294901760, %v2635_v49 }
  0x4d   :  { %394 = vmatpush.msrb.mxu0 %v4119_v40  ;;  %569 = vmatpush.msrb.mxu3 %v568_v42  ;;  %v4135_v42 = vand.u32 4294901760, %v2688_v59 }
  0x4e   :  { %437 = vmatpush.msrb.mxu1 %v2540_v33  ;;  %480 = vmatpush.msrb.mxu2 %v2756_v63  ;;  %v591_v33 = vsub.f32 %v2842_v20, %v590_v4 }
  0x4f   :  { %398 = vmatpush.msrb.mxu0 %v4120_v24  ;;  %575 = vmatpush.msrb.mxu3 %v574_v17 }
  0x50   :  { %439 = vmatpush.msrb.mxu1 %v2559_v45  ;;  %482 = vmatpush.msrb.mxu2 %v2762_v14  ;;  %v4122_v45 = vand.u32 4294901760, %v2619_v35  ;;  %v592_v29 = vand.u32 4294901760, %v591_v33  ;;  %v4126_v35 = vld [vmem:[#allocation15_spill] sm:$0xff] }
  0x51   :  { %402 = vmatpush.msrb.mxu0 %v4121_v9  ;;  %581 = vmatpush.msrb.mxu3 %v580_v57  ;;  %v822_v33 = vld [vmem:[#allocation8 + $0x60] sm:$0xff] }
  0x52   :  { %441 = vmatpush.msrb.mxu1 %v2561_v46  ;;  %484 = vmatpush.msrb.mxu2 %v2781_v41  ;;  %v4124_v46 = vand.u32 4294901760, %v2654_v7  ;;  %v4130_v7 = vld [vmem:[#allocation17_spill] sm:$0xff] }
  0x53   :  { %406 = vmatpush.msrb.mxu0 %v4122_v45  ;;  %587 = vmatpush.msrb.mxu3 %v586_v27  ;;  %v824_v27 = vld [vmem:[#allocation8 + $0x70] sm:$0xff] }
  0x54   :  { %443 = vmatpush.msrb.mxu1 %v2565_v47  ;;  %486 = vmatpush.msrb.mxu2 %v2794_v8  ;;  %v4125_v47 = vand.u32 4294901760, %v2628_v43 }
  0x55   :  { %410 = vmatpush.msrb.mxu0 %v4123_v61  ;;  %593 = vmatpush.msrb.mxu3 %v592_v29 }
  0x56   :  { %445 = vmatpush.msrb.mxu1 %v2585_v58  ;;  %488 = vmatpush.msrb.mxu2 %v2815_v16  ;;  %v4127_v58 = vld [vmem:[#allocation18_spill] sm:$0xff] }
  0x57   :  { %414 = vmatpush.msrb.mxu0 %v4124_v46  ;;  %347 = vmatmul.f32.vlgmr.msra.gmra.mxu3 %v2860_v15  ;;  %v4128_v49 = vand.u32 4294901760, %v4127_v58 }
  0x58   :  { %447 = vmatpush.msrb.mxu1 %v2592_v62  ;;  %695 = vmatpush.msra.mxu2 %v4125_v47  ;;  %v4131_v62 = vld [vmem:[#allocation19_spill] sm:$0xff] }
  0x59   :  { %153 = vmatmul.f32.vlgmr.msra.gmra.mxu0 %v152_v10  ;;  %762 = vmatpush.msra.mxu3 %v4129_v37  ;;  %v4132_v39 = vand.u32 4294901760, %v4131_v62 }
  0x5a   :  { %449 = vmatpush.msrb.mxu1 %v4126_v35  ;;  %601 = vmatpush.msra.mxu0 %v2628_v43  ;;  %v4133_v43 = vld [vmem:[#allocation20_spill] sm:$0xff] }
  0x5b   :  { %699 = vmatpush.msra.mxu2 %v4128_v49  ;;  %254 = vmatmul.f32.vlgmr.msra.gmra.mxu1 %v2820_v53  ;;  %v4134_v11 = vand.u32 4294901760, %v4133_v43  ;;  %v816_v49 = vld [vmem:[#allocation8 + $0x30] sm:$0xff] }
  0x5c   :  { %451 = vmatpush.msrb.mxu1 %v4130_v7  ;;  %604 = vmatpush.msra.mxu0 %v4127_v58 }
  0x5d   :  { %703 = vmatpush.msra.mxu2 %v4132_v39  ;;  %764 = vmatpush.msra.mxu3 %v2613_v30  ;;  %v3060_v39 = vand.u32 4294901760, %v822_v33 }
  0x5e   :  { %654 = vmatpush.msra.mxu1 %v4129_v37  ;;  %607 = vmatpush.msra.mxu0 %v4131_v62  ;;  %v3058_v62 = vand.u32 4294901760, %v824_v27 }
  0x5f   :  { %707 = vmatpush.msra.mxu2 %v4134_v11  ;;  %766 = vmatpush.msra.mxu3 %v2630_v44  ;;  %v814_v11 = vld [vmem:[#allocation8 + $0x20] sm:$0xff] }
  0x60   :  { %656 = vmatpush.msra.mxu1 %v2613_v30  ;;  %610 = vmatpush.msra.mxu0 %v4133_v43  ;;  %v4136_v30 = vand.u32 4294901760, %v2698_v1  ;;  %v3062_v43 = vand.u32 4294901760, %v820_v3 }
  0x61   :  { %711 = vmatpush.msra.mxu2 %v4135_v42  ;;  %768 = vmatpush.msra.mxu3 %v2645_v60 }
  0x62   :  { %658 = vmatpush.msra.mxu1 %v2630_v44  ;;  %416 = vmatmul.f32.vlgmr.msrb.gmra.mxu0 %v2820_v53  ;;  %v4137_v44 = vand.u32 4294901760, %v2730_v23 }
  0x63   :  { %613 = vmatpush.msra.mxu0 %v2688_v59  ;;  %715 = vmatpush.msra.mxu2 %v4136_v30 }
  0x64   :  { %660 = vmatpush.msra.mxu1 %v2645_v60  ;;  %770 = vmatpush.msra.mxu3 %v2661_v2  ;;  %v838_v60 = vld [vmem:[#allocation8 + $0xe0] sm:$0xff] }
  0x65   :  { %453 = vmatmul.f32.vlgmr.msrb.gmra.mxu1 %v2820_v53  ;;  %616 = vmatpush.msra.mxu0 %v2698_v1  ;;  %v836_v1 = vld [vmem:[#allocation8 + $0xd0] sm:$0xff] }
  0x66   :  { %662 = vmatpush.msra.mxu1 %v2661_v2  ;;  %719 = vmatpush.msra.mxu2 %v536_v51  ;;  %v4138_v2 = vand.u32 4294901760, %v2738_v25 }
  0x67   :  { %772 = vmatpush.msra.mxu3 %v2666_v54  ;;  %619 = vmatpush.msra.mxu0 %v2720_v48  ;;  %v2987_v48 = vand.u32 4294901760, %v836_v1 }
  0x68   :  { %664 = vmatpush.msra.mxu1 %v2666_v54  ;;  %723 = vmatpush.msra.mxu2 %v4137_v44 }
  0x69   :  { %774 = vmatpush.msra.mxu3 %v2690_v31  ;;  %622 = vmatpush.msra.mxu0 %v2730_v23 }
  0x6a   :  { %666 = vmatpush.msra.mxu1 %v2690_v31  ;;  %727 = vmatpush.msra.mxu2 %v4138_v2 }
  0x6b   :  { %776 = vmatpush.msra.mxu3 %v2705_v22  ;;  %625 = vmatpush.msra.mxu0 %v2738_v25  ;;  %v832_v25 = vld [vmem:[#allocation8 + $0xb0] sm:$0xff] }
  0x6c   :  { %668 = vmatpush.msra.mxu1 %v2705_v22  ;;  %731 = vmatpush.msra.mxu2 %v554_v50  ;;  %v2980_v22 = vld [vmem:[#allocation7] sm:$0x3] }
  0x6d   :  { %778 = vmatpush.msra.mxu3 %v2712_v38  ;;  %628 = vmatpush.msra.mxu0 %v2754_v0  ;;  %v112_v23 = vperm.slane %v2980_v22, 0  ;;  %v830_v0 = vld [vmem:[#allocation8 + $0xa0] sm:$0xff]  ;;  %v113_v47 = vperm.slane %v2980_v22, 1 }
  0x6e   :  { %670 = vmatpush.msra.mxu1 %v2712_v38  ;;  %735 = vmatpush.msra.mxu2 %v560_v28  ;;  %v2985_v38 = vand.u32 4294901760, %v838_v60  ;;  %v2993_v50 = vand.u32 4294901760, %v830_v0 }
  0x6f   :  { %780 = vmatpush.msra.mxu3 %v2732_v6  ;;  %631 = vmatpush.msra.mxu0 %v2768_v13  ;;  %v2991_v13 = vand.u32 4294901760, %v832_v25 }
  0x70   :  { %672 = vmatpush.msra.mxu1 %v2732_v6  ;;  %739 = vmatpush.msra.mxu2 %v566_v55  ;;  %v834_v6 = vld [vmem:[#allocation8 + $0xc0] sm:$0xff]  ;;  %v3002_v55 = vsub.f32 %v836_v1, %v2987_v48  ;;  %v3086_v1 = vand.u32 4294901760, %v814_v11 }
  0x71   :  { %782 = vmatpush.msra.mxu3 %v2744_v36  ;;  %494 = vmatmul.f32.vlgmr.msrb.gmra.mxu2 %v152_v10  ;;  %v818_v10 = vld [vmem:[#allocation8 + $0x40] sm:$0xff] }
  0x72   :  { %634 = vmatpush.msra.mxu0 %v2779_v32  ;;  %674 = vmatpush.msra.mxu1 %v2744_v36  ;;  %v840_v36 = vld [vmem:[#allocation8 + $0xf0] sm:$0xff]  ;;  %v3070_v44 = vand.u32 4294901760, %v818_v10 }
  0x73   :  { %743 = vmatpush.msra.mxu2 %v572_v21  ;;  %784 = vmatpush.msra.mxu3 %v2756_v63  ;;  %v2983_v59 = vand.u32 4294901760, %v840_v36  ;;  %v828_v32 = vld [vmem:[#allocation8 + $0x90] sm:$0xff] }
  0x74   :  { %595 = vmatmul.f32.vlgmr.msrb.gmra.mxu3 %v2820_v53  ;;  %637 = vmatpush.msra.mxu0 %v2789_v18 }
  0x75   :  { %676 = vmatpush.msra.mxu1 %v2756_v63  ;;  %747 = vmatpush.msra.mxu2 %v578_v34  ;;  %v2996_v28 = vsub.f32 %v840_v36, %v2983_v59 }
  0x76   :  { %786 = vmatpush.msra.mxu3 %v2762_v14  ;;  %640 = vmatpush.msra.mxu0 %v2805_v56  ;;  %v3006_v56 = vand.u32 4294901760, %v828_v32 }
  0x77   :  { %678 = vmatpush.msra.mxu1 %v2762_v14  ;;  %751 = vmatpush.msra.mxu2 %v584_v12  ;;  %v2989_v14 = vand.u32 4294901760, %v834_v6  ;;  %v4066_v34 = vand.u32 4294901760, %v2996_v28 }
  0x78   :  { %788 = vmatpush.msra.mxu3 %v2781_v41  ;;  %643 = vmatpush.msra.mxu0 %v2818_v26  ;;  %v3015_v26 = vsub.f32 %v830_v0, %v2993_v50  ;;  %v3028_v17 = vsub.f32 %v828_v32, %v3006_v56  ;;  %v3091_v32 = vsub.f32 %v820_v3, %v3062_v43 }
  0x79   :  { %680 = vmatpush.msra.mxu1 %v2781_v41  ;;  %755 = vmatpush.msra.mxu2 %v590_v4  ;;  %v826_v41 = vld [vmem:[#allocation8 + $0x80] sm:$0xff]  ;;  %v3009_v21 = vsub.f32 %v834_v6, %v2989_v14  ;;  %v918_v4 = vsub.f32 %v2996_v28, %v4066_v34  ;;  %v872_v6 = vld [vmem:[#allocation8 + $0x1f0] sm:$0xff] }
  0x7a   :  { %790 = vmatpush.msra.mxu3 %v2794_v8  ;;  %757 = vmatmul.f32.vlgmr.msra.gmra.mxu2 %v2820_v53  ;;  %v4058_v57 = vand.u32 4294901760, %v3015_v26  ;;  %v4057_v58 = vand.u32 4294901760, %v3028_v17 }
  0x7b   :  { %646 = vmatpush.msra.mxu0 %v2842_v20  ;;  %682 = vmatpush.msra.mxu1 %v2794_v8  ;;  %v2999_v8 = vsub.f32 %v838_v60, %v2985_v38  ;;  %v4060_v5 = vand.u32 4294901760, %v3009_v21  ;;  %v919_v45 = vand.u32 4294901760, %v918_v4 }
  0x7c   :  { %792 = vmatpush.msra.mxu3 %v2815_v16  ;;  %649 = vmatmul.f32.vlgmr.msra.gmra.mxu0 %v2839_v19  ;;  %v4061_v19 = vand.u32 4294901760, %v3002_v55  ;;  %v948_v42 = vsub.f32 %v3015_v26, %v4058_v57  ;;  %v954_v60 = vsub.f32 %v3028_v17, %v4057_v58 }
  0x7d   :  { %794 = vmatmul.f32.vlgmr.msra.gmra.mxu3 %v2820_v53  ;;  %684 = vmatpush.msra.mxu1 %v2815_v16  ;;  %v3012_v16 = vsub.f32 %v832_v25, %v2991_v13  ;;  %v3017_v53 = vand.u32 4294901760, %v826_v41  ;;  %v4063_v12 = vand.u32 4294901760, %v2999_v8  ;;  %v936_v29 = vsub.f32 %v3009_v21, %v4060_v5 }
  0x7e   :  { %688 = vmatmul.f32.vlgmr.msra.gmra.mxu1 %v2860_v15  ;;  %1071 = vmatpush.msrb.mxu3 %v2983_v59  ;;  %v930_v24 = vsub.f32 %v3002_v55, %v4061_v19  ;;  %v949_v4 = vand.u32 4294901760, %v948_v42 }
  0x7f   :  { %875 = vmatpush.msrb.mxu0 %v2983_v59  ;;  %1018 = vmatpush.msrb.mxu2 %v2996_v28  ;;  %v4059_v40 = vand.u32 4294901760, %v3012_v16  ;;  %v924_v15 = vsub.f32 %v2999_v8, %v4063_v12  ;;  %v3044_v9 = vsub.f32 %v826_v41, %v3017_v53  ;;  %v937_v22 = vand.u32 4294901760, %v936_v29  ;;  %v812_v41 = vld [vmem:[#allocation8 + $0x10] sm:$0xff]  ;;  %v870_v29 = vld [vmem:[#allocation8 + $0x1e0] sm:$0xff] }
  0x80   :  { %1073 = vmatpush.msrb.mxu3 %v2985_v38  ;;  %920 = vmatpush.msrb.mxu1 %v919_v45  ;;  %v931_v7 = vand.u32 4294901760, %v930_v24  ;;  %v3111_v45 = vsub.f32 %v814_v11, %v3086_v1 }
  0x81   :  { %877 = vmatpush.msrb.mxu0 %v2985_v38  ;;  %1021 = vmatpush.msrb.mxu2 %v2999_v8  ;;  %v925_v61 = vand.u32 4294901760, %v924_v15  ;;  %v942_v35 = vsub.f32 %v3012_v16, %v4059_v40  ;;  %v4054_v30 = vand.u32 4294901760, %v3044_v9 }
  0x82   :  { %1075 = vmatpush.msrb.mxu3 %v2987_v48 }
  0x83   :  { %879 = vmatpush.msrb.mxu0 %v2987_v48  ;;  %1024 = vmatpush.msrb.mxu2 %v3002_v55  ;;  %v943_v0 = vand.u32 4294901760, %v942_v35 }
  0x84   :  { %1077 = vmatpush.msrb.mxu3 %v2989_v14  ;;  %926 = vmatpush.msrb.mxu1 %v925_v61  ;;  %v3113_v61 = vand.u32 4294901760, %v812_v41 }
  0x85   :  { %881 = vmatpush.msrb.mxu0 %v2989_v14  ;;  %1027 = vmatpush.msrb.mxu2 %v3009_v21 }
  0x86   :  { %1079 = vmatpush.msrb.mxu3 %v2991_v13  ;;  %932 = vmatpush.msrb.mxu1 %v931_v7 }
  0x87   :  { %883 = vmatpush.msrb.mxu0 %v2991_v13  ;;  %1030 = vmatpush.msrb.mxu2 %v3012_v16 }
  0x88   :  { %1081 = vmatpush.msrb.mxu3 %v2993_v50  ;;  %938 = vmatpush.msrb.mxu1 %v937_v22  ;;  %v866_v22 = vld [vmem:[#allocation8 + $0x1c0] sm:$0xff] }
  0x89   :  { %885 = vmatpush.msrb.mxu0 %v2993_v50  ;;  %1033 = vmatpush.msrb.mxu2 %v3015_v26 }
  0x8a   :  { %1083 = vmatpush.msrb.mxu3 %v3006_v56  ;;  %944 = vmatpush.msrb.mxu1 %v943_v0  ;;  %v3135_v0 = vand.u32 4294901760, %v870_v29 }
  0x8b   :  { %887 = vmatpush.msrb.mxu0 %v3006_v56  ;;  %1036 = vmatpush.msrb.mxu2 %v3028_v17 }
  0x8c   :  { %1085 = vmatpush.msrb.mxu3 %v3017_v53  ;;  %950 = vmatpush.msrb.mxu1 %v949_v4  ;;  %v3141_v4 = vsub.f32 %v812_v41, %v3113_v61 }
  0x8d   :  { %889 = vmatpush.msrb.mxu0 %v3017_v53  ;;  %1039 = vmatpush.msrb.mxu2 %v3044_v9 }
  0x8e   :  { %1087 = vmatpush.msrb.mxu3 %v3058_v62 }
  0x8f   :  { %891 = vmatpush.msrb.mxu0 %v3058_v62 }
  0x90   :  { %1089 = vmatpush.msrb.mxu3 %v3060_v39 }
  0x91   :  { %893 = vmatpush.msrb.mxu0 %v3060_v39 }
  0x92   :  { %1091 = vmatpush.msrb.mxu3 %v3062_v43 }
  0x93   :  { %895 = vmatpush.msrb.mxu0 %v3062_v43 }
  0x94   :  { %1093 = vmatpush.msrb.mxu3 %v3070_v44 }
  0x95   :  { %897 = vmatpush.msrb.mxu0 %v3070_v44 }
  0xc8   :  { %v309_v18 = vpop.f32.mrf.mxu2 }
  0xd6   :  { %v154_v31 = vpop.f32.mrf.mxu0 }
  0xd7   :  { %v155_v51 = vadd.f32 %v154_v31, %v112_v23  ;;  %v3074_v23 = vsub.f32 %v824_v27, %v3058_v62  ;;  %v3077_v31 = vsub.f32 %v822_v33, %v3060_v39  ;;  %v810_v27 = vld [vmem:[#allocation8] sm:$0xff]  ;;  %v3106_v33 = vand.u32 4294901760, %v872_v6 }
  0xd8   :  { %v255_v54 = vpop.f32.mrf.mxu1 }
  0xd9   :  { %v256_v63 = vadd.f32 %v255_v54, %v155_v51  ;;  %v3079_v51 = vand.u32 4294901760, %v816_v49  ;;  %v4052_v15 = vand.u32 4294901760, %v3077_v31  ;;  %1042 = vmatpush.msrb.mxu2 %v3074_v23 }
  0xda   :  { %v348_v52 = vpop.f32.mrf.mxu3 }
  0xdb   :  { %v310_v20 = vadd.f32 %v309_v18, %v256_v63  ;;  %v4053_v63 = vand.u32 4294901760, %v3074_v23  ;;  %v960_v18 = vsub.f32 %v3044_v9, %v4054_v30  ;;  %v3104_v24 = vsub.f32 %v816_v49, %v3079_v51  ;;  %1045 = vmatpush.msrb.mxu2 %v3077_v31  ;;  %1095 = vmatpush.msrb.mxu3 %v3079_v51 }
  0xdc   :  { %v4055_v49 = vand.u32 4294901760, %v3091_v32  ;;  %899 = vmatpush.msrb.mxu0 %v3079_v51 }
  0xdd   :  { %v349_v46 = vadd.f32 %v348_v52, %v310_v20  ;;  %v3099_v20 = vsub.f32 %v818_v10, %v3070_v44  ;;  %v966_v35 = vsub.f32 %v3074_v23, %v4053_v63  ;;  %v961_v11 = vand.u32 4294901760, %v960_v18  ;;  %1048 = vmatpush.msrb.mxu2 %v3091_v32  ;;  %1097 = vmatpush.msrb.mxu3 %v3086_v1 }
  0xde   :  { %901 = vmatpush.msrb.mxu0 %v3086_v1 }
  0xdf   :  { %v417_v37 = vpop.f32.mrf.mxu0  ;;  %v4056_v42 = vand.u32 4294901760, %v3099_v20  ;;  %v967_v63 = vand.u32 4294901760, %v966_v35  ;;  %1051 = vmatpush.msrb.mxu2 %v3099_v20  ;;  %1099 = vmatpush.msrb.mxu3 %v3113_v61 }
  0xe0   :  { %v418_v54 = vadd.f32 %v417_v37, %v349_v46  ;;  %v868_v37 = vld [vmem:[#allocation8 + $0x1d0] sm:$0xff]  ;;  %903 = vmatpush.msrb.mxu0 %v3113_v61 }
  0xe1   :  { %v984_v41 = vsub.f32 %v3099_v20, %v4056_v42  ;;  %1054 = vmatpush.msrb.mxu2 %v3104_v24 }
  0xe2   :  { %v454_v2 = vpop.f32.mrf.mxu1 }
  0xe3   :  { %v3115_v10 = vadd.f32 %v454_v2, %v418_v54  ;;  %v3125_v2 = vand.u32 4294901760, %v810_v27  ;;  %1057 = vmatpush.msrb.mxu2 %v3111_v45 }
  0xe5   :  { %v799_v58 = vsel %vm798_vm0, %v3115_v10, -inf  ;;  %1060 = vmatpush.msrb.mxu2 %v3141_v4  ;;  %1101 = vmatpush.msrb.mxu3 %v3125_v2 }
  0xe6   :  { %905 = vmatpush.msrb.mxu0 %v3125_v2 }
  0xf4   :  { %v495_v36 = vpop.f32.mrf.mxu2 }
  0xf5   :  { %v496_v25 = vadd.f32 %v495_v36, %v113_v47  ;;  %v955_v47 = vand.u32 4294901760, %v954_v60  ;;  %v972_v36 = vsub.f32 %v3077_v31, %v4052_v15  ;;  %v4062_v60 = vand.u32 4294901760, %v3104_v24 }
  0xf7   :  { %v596_v52 = vpop.f32.mrf.mxu3  ;;  %956 = vmatpush.msrb.mxu1 %v955_v47  ;;  %v990_v57 = vsub.f32 %v3104_v24, %v4062_v60  ;;  %v985_v60 = vand.u32 4294901760, %v984_v41 }
  0xf8   :  { %v597_v3 = vadd.f32 %v596_v52, %v496_v25  ;;  %v3133_v25 = vsub.f32 %v872_v6, %v3106_v33  ;;  %v4064_v52 = vand.u32 4294901760, %v3111_v45  ;;  %v978_v6 = vsub.f32 %v3091_v32, %v4055_v49  ;;  %v862_v49 = vld [vmem:[#allocation8 + $0x1a0] sm:$0xff] }
  0xf9   :  { %v650_v46 = vpop.f32.mrf.mxu0  ;;  %962 = vmatpush.msrb.mxu1 %v961_v11  ;;  %v3184_v19 = vand.u32 4294901760, %v862_v49 }
  0xfa   :  { %v651_v7 = vadd.f32 %v650_v46, %v597_v3  ;;  %v3143_v3 = vand.u32 4294901760, %v868_v37  ;;  %v864_v46 = vld [vmem:[#allocation8 + $0x1b0] sm:$0xff]  ;;  %v4065_v47 = vand.u32 4294901760, %v3133_v25  ;;  %v979_v40 = vand.u32 4294901760, %v978_v6 }
  0xfb   :  { %v689_v54 = vpop.f32.mrf.mxu1  ;;  %968 = vmatpush.msrb.mxu1 %v967_v63  ;;  %v996_v12 = vsub.f32 %v3111_v45, %v4064_v52 }
  0xfc   :  { %v690_v18 = vadd.f32 %v689_v54, %v651_v7  ;;  %v3150_v7 = vsub.f32 %v870_v29, %v3135_v0  ;;  %v3152_v54 = vand.u32 4294901760, %v866_v22  ;;  %v3161_v35 = vsub.f32 %v868_v37, %v3143_v3 }
  0xfd   :  { %v758_v15 = vpop.f32.mrf.mxu2  ;;  %v973_v29 = vand.u32 4294901760, %v972_v36  ;;  %v4068_v37 = vand.u32 4294901760, %v3141_v4 }
  0xfe   :  { %v759_v30 = vadd.f32 %v758_v15, %v690_v18  ;;  %v3165_v15 = vsub.f32 %v810_v27, %v3125_v2  ;;  %v3167_v18 = vand.u32 4294901760, %v864_v46  ;;  %v4067_v11 = vand.u32 4294901760, %v3150_v7  ;;  %v860_v27 = vld [vmem:[#allocation8 + $0x190] sm:$0xff] }
  0xff   :  { %v3182_v5 = vsub.f32 %v866_v22, %v3152_v54  ;;  %v4069_v63 = vand.u32 4294901760, %v3161_v35  ;;  %974 = vmatpush.msrb.mxu1 %v973_v29  ;;  %v3202_v41 = vand.u32 4294901760, %v860_v27  ;;  %v991_v29 = vand.u32 4294901760, %v990_v57 }
 0x100   :  { %v795_v42 = vpop.f32.mrf.mxu3  ;;  %v1007_v22 = vand.u32 4294901760, %v3165_v15  ;;  %v3200_v6 = vsub.f32 %v864_v46, %v3167_v18  ;;  %v1002_v34 = vsub.f32 %v3141_v4, %v4068_v37  ;;  %v997_v57 = vand.u32 4294901760, %v996_v12  ;;  %1063 = vmatpush.msrb.mxu2 %v3165_v15 }
 0x101   :  { %v3178_v36 = vadd.f32 %v795_v42, %v759_v30  ;;  %v1259_v30 = vsub.f32 %v3133_v25, %v4065_v47  ;;  %v1265_v47 = vsub.f32 %v3150_v7, %v4067_v11  ;;  %980 = vmatpush.msrb.mxu1 %v979_v40  ;;  %v4070_v46 = vand.u32 4294901760, %v3182_v5 }
 0x102   :  { %v1271_v40 = vsub.f32 %v3161_v35, %v4069_v63  ;;  %v1008_v11 = vsub.f32 %v3165_v15, %v1007_v22  ;;  %v1282_v37 = vand.u32 4294901760, %v3200_v6  ;;  %1216 = vmatpush.msra.mxu2 %v3106_v33 }
 0x103   :  { %v800_v42 = vsel %vm798_vm0, %v3178_v36, -inf  ;;  %986 = vmatpush.msrb.mxu1 %v985_v60  ;;  %v1277_v12 = vsub.f32 %v3182_v5, %v4070_v46 }
 0x104   :  { %v801_v52 = vmax.f32 %v799_v58, %v800_v42  ;;  %v3215_v58 = vsub.f32 %v862_v49, %v3184_v19  ;;  %v1260_v42 = vand.u32 4294901760, %v1259_v30  ;;  %v3227_v49 = vsub.f32 %v860_v27, %v3202_v41  ;;  %1218 = vmatpush.msra.mxu2 %v3135_v0 }
 0x105   :  { %992 = vmatpush.msrb.mxu1 %v991_v29  ;;  %v1003_v30 = vand.u32 4294901760, %v1002_v34  ;;  %v1272_v27 = vand.u32 4294901760, %v1271_v40  ;;  %v1009_v63 = vand.u32 4294901760, %v1008_v11  ;;  %v1283_v34 = vsub.f32 %v3200_v6, %v1282_v37 }
 0x106   :  { %802 = vmax.xlane.f32.xlu0 %v801_v52  ;;  %v1266_v52 = vand.u32 4294901760, %v1265_v47  ;;  %v1288_v60 = vand.u32 4294901760, %v3215_v58  ;;  %1261 = vmatpush.msra.mxu3 %v1260_v42  ;;  %v1294_v47 = vand.u32 4294901760, %v3227_v49  ;;  %v4139_v29 = vand.u32 4294901760, %v2996_v28 }
 0x107   :  { %998 = vmatpush.msrb.mxu1 %v997_v57  ;;  %v1278_v46 = vand.u32 4294901760, %v1277_v12  ;;  %1220 = vmatpush.msra.mxu2 %v3143_v3  ;;  %v4140_v42 = vand.u32 4294901760, %v2999_v8  ;;  %v1284_v40 = vand.u32 4294901760, %v1283_v34  ;;  %v4141_v28 = vand.u32 4294901760, %v3002_v55 }
 0x108   :  { %1267 = vmatpush.msra.mxu3 %v1266_v52  ;;  %1112 = vmatpush.msra.mxu0 %v4139_v29  ;;  %v1289_v11 = vsub.f32 %v3215_v58, %v1288_v60  ;;  %v1295_v57 = vsub.f32 %v3227_v49, %v1294_v47  ;;  %v4142_v8 = vand.u32 4294901760, %v3009_v21  ;;  %v4144_v55 = vand.u32 4294901760, %v3015_v26 }
 0x109   :  { %1004 = vmatpush.msrb.mxu1 %v1003_v30  ;;  %1222 = vmatpush.msra.mxu2 %v3152_v54  ;;  %v4146_v21 = vand.u32 4294901760, %v3044_v9  ;;  %v4152_v26 = vand.u32 4294901760, %v3111_v45 }
 0x10a   :  { %1273 = vmatpush.msra.mxu3 %v1272_v27  ;;  %1116 = vmatpush.msra.mxu0 %v4140_v42  ;;  %v1290_v52 = vand.u32 4294901760, %v1289_v11  ;;  %v1296_v30 = vand.u32 4294901760, %v1295_v57  ;;  %v846_v11 = vld [vmem:[#allocation8 + $0x120] sm:$0xff] }
 0x10b   :  { %1010 = vmatpush.msrb.mxu1 %v1009_v63  ;;  %1224 = vmatpush.msra.mxu2 %v3167_v18  ;;  %v858_v63 = vld [vmem:[#allocation8 + $0x180] sm:$0xff]  ;;  %v3349_v57 = vand.u32 4294901760, %v846_v11 }
 0x10c   :  { %1279 = vmatpush.msra.mxu3 %v1278_v46  ;;  %1120 = vmatpush.msra.mxu0 %v4141_v28 }
 0x10d   :  { %1179 = vmatpush.msra.mxu1 %v2983_v59  ;;  %1226 = vmatpush.msra.mxu2 %v3184_v19  ;;  %v4143_v59 = vand.u32 4294901760, %v3012_v16  ;;  %v4148_v16 = vand.u32 4294901760, %v3077_v31  ;;  %v852_v31 = vld [vmem:[#allocation8 + $0x150] sm:$0xff] }
 0x10e   :  { %1285 = vmatpush.msra.mxu3 %v1284_v40  ;;  %1124 = vmatpush.msra.mxu0 %v4142_v8  ;;  %v844_v8 = vld [vmem:[#allocation8 + $0x110] sm:$0xff] }
 0x10f   :  { %1181 = vmatpush.msra.mxu1 %v2985_v38  ;;  %1228 = vmatpush.msra.mxu2 %v3202_v41  ;;  %v3268_v38 = vand.u32 4294901760, %v858_v63 }
 0x110   :  { %1291 = vmatpush.msra.mxu3 %v1290_v52  ;;  %1128 = vmatpush.msra.mxu0 %v4143_v59  ;;  %v3362_v59 = vand.u32 4294901760, %v844_v8 }
 0x111   :  { %1183 = vmatpush.msra.mxu1 %v2987_v48  ;;  %1230 = vmatpush.msra.mxu2 %v3268_v38  ;;  %v4145_v48 = vand.u32 4294901760, %v3028_v17  ;;  %v856_v17 = vld [vmem:[#allocation8 + $0x170] sm:$0xff] }
 0x112   :  { %1297 = vmatpush.msra.mxu3 %v1296_v30  ;;  %1132 = vmatpush.msra.mxu0 %v4144_v55  ;;  %v3305_v9 = vand.u32 4294901760, %v856_v17  ;;  %v3365_v55 = vsub.f32 %v846_v11, %v3349_v57 }
 0x113   :  { %1185 = vmatpush.msra.mxu1 %v2989_v14  ;;  %v4147_v14 = vand.u32 4294901760, %v3074_v23 }
 0x114   :  { %1136 = vmatpush.msra.mxu0 %v4145_v48  ;;  %1232 = vmatpush.msra.mxu2 %v3305_v9  ;;  %v3315_v23 = vsub.f32 %v856_v17, %v3305_v9 }
 0x115   :  { %1187 = vmatpush.msra.mxu1 %v2991_v13  ;;  %v4149_v13 = vand.u32 4294901760, %v3091_v32  ;;  %v3322_v32 = vand.u32 4294901760, %v852_v31 }
 0x116   :  { %1140 = vmatpush.msra.mxu0 %v4146_v21  ;;  %v842_v21 = vld [vmem:[#allocation8 + $0x100] sm:$0xff] }
 0x117   :  { %1189 = vmatpush.msra.mxu1 %v2993_v50  ;;  %v4150_v50 = vand.u32 4294901760, %v3099_v20  ;;  %v3335_v15 = vsub.f32 %v852_v31, %v3322_v32 }
 0x118   :  { %1144 = vmatpush.msra.mxu0 %v4147_v14 }
 0x119   :  { %1191 = vmatpush.msra.mxu1 %v3006_v56  ;;  %v4151_v56 = vand.u32 4294901760, %v3104_v24  ;;  %v850_v24 = vld [vmem:[#allocation8 + $0x140] sm:$0xff]  ;;  %v1318_v29 = vand.u32 4294901760, %v3335_v15 }
 0x11a   :  { %1148 = vmatpush.msra.mxu0 %v4148_v16 }
 0x11b   :  { %1193 = vmatpush.msra.mxu1 %v3017_v53  ;;  %v4153_v53 = vand.u32 4294901760, %v3141_v4  ;;  %v3332_v4 = vand.u32 4294901760, %v850_v24  ;;  %v1319_v52 = vsub.f32 %v3335_v15, %v1318_v29 }
 0x11c   :  { %1152 = vmatpush.msra.mxu0 %v4149_v13  ;;  %v1336_v13 = vand.u32 4294901760, %v3365_v55 }
 0x11d   :  { %1195 = vmatpush.msra.mxu1 %v3058_v62  ;;  %v3308_v62 = vsub.f32 %v858_v63, %v3268_v38  ;;  %v3344_v34 = vsub.f32 %v850_v24, %v3332_v4  ;;  %v1320_v48 = vand.u32 4294901760, %v1319_v52 }
 0x11e   :  { %1156 = vmatpush.msra.mxu0 %v4150_v50  ;;  %v3372_v50 = vand.u32 4294901760, %v842_v21 }
 0x11f   :  { %1197 = vmatpush.msra.mxu1 %v3060_v39  ;;  %v854_v39 = vld [vmem:[#allocation8 + $0x160] sm:$0xff]  ;;  %v1324_v40 = vand.u32 4294901760, %v3344_v34 }
 0x120   :  { %1160 = vmatpush.msra.mxu0 %v4151_v56  ;;  %v3375_v56 = vsub.f32 %v844_v8, %v3362_v59  ;;  %v3382_v17 = vsub.f32 %v842_v21, %v3372_v50 }
 0x121   :  { %1199 = vmatpush.msra.mxu1 %v3062_v43  ;;  %v1300_v43 = vand.u32 4294901760, %v3308_v62  ;;  %v1325_v63 = vsub.f32 %v3344_v34, %v1324_v40 }
 0x122   :  { %1164 = vmatpush.msra.mxu0 %v4152_v26 }
 0x123   :  { %1201 = vmatpush.msra.mxu1 %v3070_v44  ;;  %v3312_v44 = vand.u32 4294901760, %v854_v39  ;;  %v1326_v14 = vand.u32 4294901760, %v1325_v63 }
 0x124   :  { %1168 = vmatpush.msra.mxu0 %v4153_v53  ;;  %v1337_v53 = vsub.f32 %v3365_v55, %v1336_v13 }
 0x125   :  { %1203 = vmatpush.msra.mxu1 %v3079_v51  ;;  %v1301_v51 = vsub.f32 %v3308_v62, %v1300_v43  ;;  %1234 = vmatpush.msra.mxu2 %v3312_v44  ;;  %v3325_v20 = vsub.f32 %v854_v39, %v3312_v44  ;;  %v1342_v39 = vand.u32 4294901760, %v3375_v56 }
 0x126   :  { %1172 = vmatpush.msra.mxu0 %v1007_v22  ;;  %v848_v22 = vld [vmem:[#allocation8 + $0x130] sm:$0xff]  ;;  %v1338_v31 = vand.u32 4294901760, %v1337_v53 }
 0x127   :  { %1205 = vmatpush.msra.mxu1 %v3086_v1  ;;  %v1306_v1 = vand.u32 4294901760, %v3315_v23  ;;  %v1302_v45 = vand.u32 4294901760, %v1301_v51  ;;  %1236 = vmatpush.msra.mxu2 %v3322_v32  ;;  %v3341_v27 = vand.u32 4294901760, %v848_v22  ;;  %v1348_v51 = vand.u32 4294901760, %v3382_v17 }
 0x128   :  { %v1343_v24 = vsub.f32 %v3375_v56, %v1342_v39 }
 0x129   :  { %1207 = vmatpush.msra.mxu1 %v3113_v61  ;;  %v1307_v61 = vsub.f32 %v3315_v23, %v1306_v1  ;;  %1303 = vmatpush.msra.mxu3 %v1302_v45  ;;  %v3352_v28 = vsub.f32 %v848_v22, %v3341_v27  ;;  %v1349_v45 = vsub.f32 %v3382_v17, %v1348_v51 }
 0x12a   :  { %1238 = vmatpush.msra.mxu2 %v3332_v4 }
 0x12b   :  { %1209 = vmatpush.msra.mxu1 %v3125_v2  ;;  %v1312_v2 = vand.u32 4294901760, %v3325_v20  ;;  %v1308_v46 = vand.u32 4294901760, %v1307_v61  ;;  %v1330_v30 = vand.u32 4294901760, %v3352_v28  ;;  %v1344_v61 = vand.u32 4294901760, %v1343_v24 }
 0x12c   :  { %1240 = vmatpush.msra.mxu2 %v3341_v27  ;;  %v1350_v22 = vand.u32 4294901760, %v1349_v45 }
 0x12d   :  { %v1313_v12 = vsub.f32 %v3325_v20, %v1312_v2  ;;  %1309 = vmatpush.msra.mxu3 %v1308_v46  ;;  %v1331_v16 = vsub.f32 %v3352_v28, %v1330_v30 }
 0x12e   :  { %1242 = vmatpush.msra.mxu2 %v3349_v57 }
 0x12f   :  { %v1314_v42 = vand.u32 4294901760, %v1313_v12  ;;  %v1332_v26 = vand.u32 4294901760, %v1331_v16  ;;  %v4157_v16 = vand.u32 4294901760, %v3133_v25 }
 0x130   :  { %1244 = vmatpush.msra.mxu2 %v3362_v59 }
 0x131   :  { %1315 = vmatpush.msra.mxu3 %v1314_v42 }
 0x132   :  { %1246 = vmatpush.msra.mxu2 %v3372_v50 }
 0x133   :  { %1321 = vmatpush.msra.mxu3 %v1320_v48 }
 0x135   :  { %1327 = vmatpush.msra.mxu3 %v1326_v14 }
 0x137   :  { %1333 = vmatpush.msra.mxu3 %v1332_v26 }
 0x139   :  { %1339 = vmatpush.msra.mxu3 %v1338_v31  ;;  %v4159_v31 = vand.u32 4294901760, %v3150_v7 }
 0x13b   :  { %1345 = vmatpush.msra.mxu3 %v1344_v61  ;;  %v4160_v61 = vand.u32 4294901760, %v3161_v35 }
 0x13d   :  { %1351 = vmatpush.msra.mxu3 %v1350_v22 }
 0x179   :  { %v803_v46 = vpop.xlane.xlu0 %802 }
 0x17a   :  { %v804_v12 = vsub.f32 %v3115_v10, %v803_v46  ;;  %v805_v11 = vsub.f32 %v3178_v36, %v803_v46  ;;  %v825_v46 = vld [vmem:[#allocation8 + $0x78] sm:$0xff] }
 0x17c   :  { %v806_v42 = vmul.f32 1.442695, %v804_v12  ;;  %v808_v52 = vmul.f32 1.442695, %v805_v11 }
 0x17e   :  { %2300 = vpow2.f32 %v806_v42  ;;  %v3554_v42 = vand.u32 4294901760, %v825_v46 }
 0x17f   :  { %2302 = vpow2.f32 %v808_v52 }
 0x184   :  { %v3394_v8 = vpop.eup %2300 }
 0x185   :  { %4154 = vst [vmem:[#allocation15_spill] sm:$0xff] %v3394_v8  ;;  %v3396_v63 = vpop.eup %2302  ;;  %v3399_v48 = vand.u32 4294901760, %v3394_v8 }
 0x186   :  { %4155 = vst [vmem:[#allocation18_spill] sm:$0xff] %v3396_v63  ;;  %v3402_v21 = vand.u32 4294901760, %v3396_v63 }
 0x187   :  { %1012 = vmatmul.f32.vlgmr.msrb.gmra.mxu1 %v3399_v48  ;;  %v3407_v10 = vsub.f32 %v3394_v8, %v3399_v48 }
 0x188   :  { %1412 = vmatpush.msrb.mxu1 %v3106_v33  ;;  %v3412_v36 = vsub.f32 %v3396_v63, %v3402_v21  ;;  %v853_v63 = vld [vmem:[#allocation8 + $0x158] sm:$0xff] }
 0x189   :  { %1066 = vmatmul.f32.vlgmr.msrb.gmra.mxu2 %v3407_v10  ;;  %v3416_v14 = vand.u32 4294901760, %v3407_v10 }
 0x18a   :  { %4156 = vst [vmem:[#allocation16_spill] sm:$0xff] %v3412_v36  ;;  %1414 = vmatpush.msrb.mxu1 %v3135_v0  ;;  %1453 = vmatpush.msrb.mxu2 %v4157_v16  ;;  %v3422_v26 = vand.u32 4294901760, %v3412_v36  ;;  %v821_v16 = vld [vmem:[#allocation8 + $0x58] sm:$0xff] }
 0x18b   :  { %1105 = vmatmul.f32.vlgmr.msrb.gmra.mxu3 %v3416_v14  ;;  %v909_v53 = vsub.f32 %v3407_v10, %v3416_v14 }
 0x18c   :  { %4158 = vst [vmem:[#allocation17_spill] sm:$0xff] %v3422_v26  ;;  %1416 = vmatpush.msrb.mxu1 %v3143_v3  ;;  %1457 = vmatpush.msrb.mxu2 %v4159_v31  ;;  %v1250_v24 = vsub.f32 %v3412_v36, %v3422_v26 }
 0x18d   :  { %1520 = vmatpush.msrb.mxu3 %v3106_v33  ;;  %v3433_v45 = vand.u32 4294901760, %v909_v53  ;;  %v4161_v33 = vand.u32 4294901760, %v3182_v5 }
 0x18e   :  { %1418 = vmatpush.msrb.mxu1 %v3152_v54  ;;  %1461 = vmatpush.msrb.mxu2 %v4160_v61  ;;  %v3442_v22 = vand.u32 4294901760, %v1250_v24  ;;  %v819_v24 = vld [vmem:[#allocation8 + $0x48] sm:$0xff]  ;;  %v3581_v61 = vand.u32 4294901760, %v821_v16 }
 0x18f   :  { %1522 = vmatpush.msrb.mxu3 %v3135_v0  ;;  %911 = vmatmul.f32.vlgmr.msrb.gmra.mxu0 %v3433_v45  ;;  %v839_v0 = vld [vmem:[#allocation8 + $0xe8] sm:$0xff] }
 0x190   :  { %1211 = vmatmul.f32.vlgmr.msra.gmra.mxu1 %v3399_v48  ;;  %1359 = vmatpush.msrb.mxu0 %v3133_v25  ;;  %v841_v25 = vld [vmem:[#allocation8 + $0xf8] sm:$0xff] }
 0x191   :  { %1420 = vmatpush.msrb.mxu1 %v3167_v18  ;;  %1465 = vmatpush.msrb.mxu2 %v4161_v33 }
 0x192   :  { %1524 = vmatpush.msrb.mxu3 %v3143_v3  ;;  %1252 = vmatmul.f32.vlgmr.msra.gmra.mxu2 %v3442_v22  ;;  %v3461_v3 = vand.u32 4294901760, %v841_v25 }
 0x193   :  { %1362 = vmatpush.msrb.mxu0 %v3150_v7  ;;  %1422 = vmatpush.msrb.mxu1 %v3184_v19  ;;  %v837_v7 = vld [vmem:[#allocation8 + $0xd8] sm:$0xff] }
 0x194   :  { %1469 = vmatpush.msrb.mxu2 %v1282_v37  ;;  %1526 = vmatpush.msrb.mxu3 %v3152_v54  ;;  %v3468_v54 = vand.u32 4294901760, %v839_v0 }
 0x195   :  { %1353 = vmatmul.f32.vlgmr.msra.gmra.mxu3 %v3402_v21  ;;  %1365 = vmatpush.msrb.mxu0 %v3161_v35  ;;  %v835_v35 = vld [vmem:[#allocation8 + $0xc8] sm:$0xff] }
 0x196   :  { %1424 = vmatpush.msrb.mxu1 %v3202_v41  ;;  %1473 = vmatpush.msrb.mxu2 %v1288_v60  ;;  %v3486_v37 = vsub.f32 %v839_v0, %v3468_v54 }
 0x197   :  { %1528 = vmatpush.msrb.mxu3 %v3167_v18  ;;  %1368 = vmatpush.msrb.mxu0 %v3182_v5  ;;  %v3476_v5 = vsub.f32 %v841_v25, %v3461_v3  ;;  %v3478_v18 = vand.u32 4294901760, %v837_v7  ;;  %v817_v25 = vld [vmem:[#allocation8 + $0x38] sm:$0xff] }
 0x198   :  { %1426 = vmatpush.msrb.mxu1 %v3268_v38  ;;  %1477 = vmatpush.msrb.mxu2 %v1294_v47  ;;  %v831_v47 = vld [vmem:[#allocation8 + $0xa8] sm:$0xff] }
 0x199   :  { %1530 = vmatpush.msrb.mxu3 %v3184_v19  ;;  %1174 = vmatmul.f32.vlgmr.msra.gmra.mxu0 %v3399_v48  ;;  %v833_v19 = vld [vmem:[#allocation8 + $0xb8] sm:$0xff] }
 0x19a   :  { %1371 = vmatpush.msrb.mxu0 %v3200_v6  ;;  %1428 = vmatpush.msrb.mxu1 %v3305_v9  ;;  %v3488_v6 = vand.u32 4294901760, %v835_v35  ;;  %v3499_v60 = vand.u32 4294901760, %v833_v19 }
 0x19b   :  { %1481 = vmatpush.msrb.mxu2 %v1300_v43  ;;  %1532 = vmatpush.msrb.mxu3 %v3202_v41  ;;  %v4086_v41 = vand.u32 4294901760, %v3476_v5  ;;  %v3512_v43 = vand.u32 4294901760, %v831_v47 }
 0x19c   :  { %1374 = vmatpush.msrb.mxu0 %v3215_v58  ;;  %1430 = vmatpush.msrb.mxu1 %v3312_v44  ;;  %v3497_v58 = vsub.f32 %v837_v7, %v3478_v18  ;;  %v3593_v7 = vand.u32 4294901760, %v819_v24 }
 0x19d   :  { %1485 = vmatpush.msrb.mxu2 %v1306_v1  ;;  %1534 = vmatpush.msrb.mxu3 %v3268_v38  ;;  %v4085_v38 = vand.u32 4294901760, %v3486_v37 }
 0x19e   :  { %1377 = vmatpush.msrb.mxu0 %v3227_v49  ;;  %1432 = vmatpush.msrb.mxu1 %v3322_v32  ;;  %v829_v49 = vld [vmem:[#allocation8 + $0x98] sm:$0xff]  ;;  %v4084_v1 = vand.u32 4294901760, %v3497_v58 }
 0x19f   :  { %1489 = vmatpush.msrb.mxu2 %v1312_v2  ;;  %1536 = vmatpush.msrb.mxu3 %v3305_v9  ;;  %v3508_v9 = vsub.f32 %v835_v35, %v3488_v6  ;;  %v3522_v2 = vsub.f32 %v833_v19, %v3499_v60 }
 0x1a0   :  { %1380 = vmatpush.msrb.mxu0 %v3308_v62  ;;  %1434 = vmatpush.msrb.mxu1 %v3332_v4  ;;  %v827_v62 = vld [vmem:[#allocation8 + $0x88] sm:$0xff] }
 0x1a1   :  { %1493 = vmatpush.msrb.mxu2 %v1318_v29  ;;  %1538 = vmatpush.msrb.mxu3 %v3312_v44  ;;  %v1600_v44 = vsub.f32 %v3476_v5, %v4086_v41  ;;  %v4083_v29 = vand.u32 4294901760, %v3508_v9  ;;  %v4082_v12 = vand.u32 4294901760, %v3522_v2 }
 0x1a2   :  { %1383 = vmatpush.msrb.mxu0 %v3315_v23  ;;  %1436 = vmatpush.msrb.mxu1 %v3341_v27  ;;  %v3524_v23 = vand.u32 4294901760, %v829_v49 }
 0x1a3   :  { %1497 = vmatpush.msrb.mxu2 %v1324_v40  ;;  %1540 = vmatpush.msrb.mxu3 %v3322_v32  ;;  %v1606_v32 = vsub.f32 %v3486_v37, %v4085_v38  ;;  %v3535_v40 = vand.u32 4294901760, %v827_v62 }
 0x1a4   :  { %1386 = vmatpush.msrb.mxu0 %v3325_v20  ;;  %1438 = vmatpush.msrb.mxu1 %v3349_v57  ;;  %v3540_v20 = vsub.f32 %v831_v47, %v3512_v43  ;;  %v3550_v11 = vsub.f32 %v829_v49, %v3524_v23  ;;  %v3603_v47 = vsub.f32 %v821_v16, %v3581_v61  ;;  %v3605_v49 = vand.u32 4294901760, %v817_v25 }
 0x1a5   :  { %1501 = vmatpush.msrb.mxu2 %v1330_v30  ;;  %1542 = vmatpush.msrb.mxu3 %v3332_v4  ;;  %v1601_v4 = vand.u32 4294901760, %v1600_v44  ;;  %v1612_v30 = vsub.f32 %v3497_v58, %v4084_v1  ;;  %v3563_v52 = vsub.f32 %v827_v62, %v3535_v40  ;;  %v813_v44 = vld [vmem:[#allocation8 + $0x18] sm:$0xff]  ;;  %v859_v1 = vld [vmem:[#allocation8 + $0x188] sm:$0xff] }
 0x1a6   :  { %1389 = vmatpush.msrb.mxu0 %v3335_v15  ;;  %1440 = vmatpush.msrb.mxu1 %v3362_v59  ;;  %v823_v15 = vld [vmem:[#allocation8 + $0x68] sm:$0xff]  ;;  %v4079_v31 = vand.u32 4294901760, %v3550_v11  ;;  %v3627_v16 = vsub.f32 %v817_v25, %v3605_v49  ;;  %v3749_v38 = vand.u32 4294901760, %v859_v1 }
 0x1a7   :  { %1505 = vmatpush.msrb.mxu2 %v1336_v13  ;;  %1544 = vmatpush.msrb.mxu3 %v3341_v27  ;;  %v1607_v27 = vand.u32 4294901760, %v1606_v32  ;;  %v1618_v13 = vsub.f32 %v3508_v9, %v4083_v29  ;;  %v3568_v53 = vand.u32 4294901760, %v823_v15  ;;  %v4077_v33 = vand.u32 4294901760, %v3563_v52  ;;  %v861_v29 = vld [vmem:[#allocation8 + $0x198] sm:$0xff] }
 0x1a8   :  { %1392 = vmatpush.msrb.mxu0 %v3344_v34  ;;  %1442 = vmatpush.msrb.mxu1 %v3372_v50  ;;  %v4081_v34 = vand.u32 4294901760, %v3540_v20  ;;  %v1636_v19 = vsub.f32 %v3550_v11, %v4079_v31  ;;  %v865_v31 = vld [vmem:[#allocation8 + $0x1b8] sm:$0xff]  ;;  %v3736_v41 = vand.u32 4294901760, %v861_v29 }
 0x1a9   :  { %1509 = vmatpush.msrb.mxu2 %v1342_v39  ;;  %1546 = vmatpush.msrb.mxu3 %v3349_v57  ;;  %v1613_v57 = vand.u32 4294901760, %v1612_v30  ;;  %v1624_v39 = vsub.f32 %v3522_v2, %v4082_v12  ;;  %v3591_v0 = vsub.f32 %v823_v15, %v3568_v53  ;;  %v1642_v62 = vsub.f32 %v3563_v52, %v4077_v33  ;;  %v811_v15 = vld [vmem:[#allocation8 + $0x8] sm:$0xff] }
 0x1aa   :  { %1446 = vmatmul.f32.vlgmr.msrb.gmra.mxu1 %v3422_v26  ;;  %1395 = vmatpush.msrb.mxu0 %v3352_v28  ;;  %v3579_v28 = vsub.f32 %v825_v46, %v3554_v42  ;;  %v3641_v25 = vand.u32 4294901760, %v811_v15  ;;  %v867_v33 = vld [vmem:[#allocation8 + $0x1c8] sm:$0xff] }
 0x1ab   :  { %1602 = vmatpush.msra.mxu1 %v1601_v4  ;;  %1513 = vmatpush.msrb.mxu2 %v1348_v51  ;;  %v1619_v51 = vand.u32 4294901760, %v1618_v13  ;;  %v1625_v35 = vand.u32 4294901760, %v1624_v39  ;;  %v4073_v46 = vand.u32 4294901760, %v3591_v0  ;;  %v3615_v4 = vsub.f32 %v819_v24, %v3593_v7 }
 0x1ac   :  { %1548 = vmatpush.msrb.mxu3 %v3362_v59  ;;  %1515 = vmatmul.f32.vlgmr.msrb.gmra.mxu2 %v3402_v21  ;;  %v1630_v59 = vsub.f32 %v3540_v20, %v4081_v34  ;;  %v4072_v13 = vand.u32 4294901760, %v3603_v47 }
 0x1ad   :  { %1608 = vmatpush.msra.mxu1 %v1607_v27  ;;  %1700 = vmatpush.msra.mxu2 %v3476_v5  ;;  %v1654_v39 = vsub.f32 %v3591_v0, %v4073_v46  ;;  %v4071_v24 = vand.u32 4294901760, %v3615_v4 }
 0x1ae   :  { %1398 = vmatpush.msrb.mxu0 %v3365_v55  ;;  %1550 = vmatpush.msrb.mxu3 %v3372_v50  ;;  %v815_v55 = vld [vmem:[#allocation8 + $0x28] sm:$0xff]  ;;  %v4075_v50 = vand.u32 4294901760, %v3579_v28  ;;  %v1631_v32 = vand.u32 4294901760, %v1630_v59 }
 0x1af   :  { %1552 = vmatmul.f32.vlgmr.msrb.gmra.mxu3 %v3402_v21  ;;  %1614 = vmatpush.msra.mxu1 %v1613_v57  ;;  %v3617_v30 = vand.u32 4294901760, %v815_v55  ;;  %v3629_v57 = vand.u32 4294901760, %v813_v44 }
 0x1b0   :  { %1703 = vmatpush.msra.mxu2 %v3486_v37  ;;  %1753 = vmatpush.msra.mxu3 %v3461_v3  ;;  %v1648_v27 = vsub.f32 %v3579_v28, %v4075_v50  ;;  %v869_v50 = vld [vmem:[#allocation8 + $0x1d8] sm:$0xff] }
 0x1b1   :  { %1401 = vmatpush.msrb.mxu0 %v3375_v56  ;;  %1620 = vmatpush.msra.mxu1 %v1619_v51  ;;  %v1637_v56 = vand.u32 4294901760, %v1636_v19  ;;  %v3639_v51 = vsub.f32 %v815_v55, %v3617_v30  ;;  %v4074_v19 = vand.u32 4294901760, %v3627_v16  ;;  %v1655_v55 = vand.u32 4294901760, %v1654_v39 }
 0x1b2   :  { %1706 = vmatpush.msra.mxu2 %v3497_v58  ;;  %1755 = vmatpush.msra.mxu3 %v3468_v54  ;;  %v1649_v59 = vand.u32 4294901760, %v1648_v27  ;;  %v3661_v27 = vsub.f32 %v811_v15, %v3641_v25  ;;  %v871_v15 = vld [vmem:[#allocation8 + $0x1e8] sm:$0xff] }
 0x1b3   :  { %1404 = vmatpush.msrb.mxu0 %v3382_v17  ;;  %1626 = vmatpush.msra.mxu1 %v1625_v35  ;;  %v1643_v17 = vand.u32 4294901760, %v1642_v62  ;;  %v1660_v35 = vsub.f32 %v3603_v47, %v4072_v13  ;;  %v3651_v62 = vsub.f32 %v813_v44, %v3629_v57  ;;  %v873_v44 = vld [vmem:[#allocation8 + $0x1f8] sm:$0xff]  ;;  %v1672_v39 = vsub.f32 %v3627_v16, %v4074_v19 }
 0x1b4   :  { %1407 = vmatmul.f32.vlgmr.msrb.gmra.mxu0 %v3412_v36  ;;  %1709 = vmatpush.msra.mxu2 %v3508_v9  ;;  %4162 = vst [vmem:[#allocation19_spill] sm:$0xff] %v3661_v27  ;;  %v3677_v46 = vand.u32 4294901760, %v873_v44 }
 0x1b5   :  { %1557 = vmatpush.msra.mxu0 %v3461_v3  ;;  %1757 = vmatpush.msra.mxu3 %v3478_v18  ;;  %v1673_v19 = vand.u32 4294901760, %v1672_v39 }
 0x1b6   :  { %1632 = vmatpush.msra.mxu1 %v1631_v32  ;;  %1712 = vmatpush.msra.mxu2 %v3522_v2  ;;  %v1666_v32 = vsub.f32 %v3615_v4, %v4071_v24  ;;  %v4078_v24 = vand.u32 4294901760, %v3651_v62  ;;  %v3694_v39 = vsub.f32 %v873_v44, %v3677_v46  ;;  %v3706_v44 = vand.u32 4294901760, %v867_v33 }
 0x1b7   :  { %1559 = vmatpush.msra.mxu0 %v3468_v54  ;;  %1759 = vmatpush.msra.mxu3 %v3488_v6 }
 0x1b8   :  { %1638 = vmatpush.msra.mxu1 %v1637_v56  ;;  %1715 = vmatpush.msra.mxu2 %v3540_v20  ;;  %v4076_v56 = vand.u32 4294901760, %v3639_v51  ;;  %v1667_v13 = vand.u32 4294901760, %v1666_v32  ;;  %v3685_v32 = vand.u32 4294901760, %v871_v15  ;;  %v4087_v12 = vand.u32 4294901760, %v3694_v39 }
 0x1b9   :  { %1561 = vmatpush.msra.mxu0 %v3478_v18  ;;  %1761 = vmatpush.msra.mxu3 %v3499_v60 }
 0x1ba   :  { %1644 = vmatpush.msra.mxu1 %v1643_v17  ;;  %1718 = vmatpush.msra.mxu2 %v3550_v11  ;;  %v1661_v17 = vand.u32 4294901760, %v1660_v35  ;;  %v4080_v35 = vand.u32 4294901760, %v3661_v27 }
 0x1bb   :  { %1563 = vmatpush.msra.mxu0 %v3488_v6  ;;  %1763 = vmatpush.msra.mxu3 %v3512_v43 }
 0x1bc   :  { %1650 = vmatpush.msra.mxu1 %v1649_v59  ;;  %1721 = vmatpush.msra.mxu2 %v3563_v52  ;;  %v1678_v59 = vsub.f32 %v3639_v51, %v4076_v56 }
 0x1bd   :  { %1565 = vmatpush.msra.mxu0 %v3499_v60  ;;  %1765 = vmatpush.msra.mxu3 %v3524_v23 }
 0x1be   :  { %1656 = vmatpush.msra.mxu1 %v1655_v55  ;;  %1724 = vmatpush.msra.mxu2 %v3579_v28  ;;  %v1684_v55 = vsub.f32 %v3651_v62, %v4078_v24  ;;  %v1679_v56 = vand.u32 4294901760, %v1678_v59  ;;  %v3698_v24 = vand.u32 4294901760, %v869_v50  ;;  %v3702_v59 = vsub.f32 %v871_v15, %v3685_v32 }
 0x1bf   :  { %1567 = vmatpush.msra.mxu0 %v3512_v43  ;;  %1767 = vmatpush.msra.mxu3 %v3535_v40 }
 0x1c0   :  { %1662 = vmatpush.msra.mxu1 %v1661_v17  ;;  %1727 = vmatpush.msra.mxu2 %v3591_v0  ;;  %v1690_v17 = vsub.f32 %v3661_v27, %v4080_v35  ;;  %v863_v35 = vld [vmem:[#allocation8 + $0x1a8] sm:$0xff]  ;;  %v3715_v15 = vsub.f32 %v869_v50, %v3698_v24  ;;  %v1941_v50 = vsub.f32 %v3694_v39, %v4087_v12 }
 0x1c1   :  { %1569 = vmatpush.msra.mxu0 %v3524_v23  ;;  %1769 = vmatpush.msra.mxu3 %v3554_v42  ;;  %v3760_v12 = vsub.f32 %v861_v29, %v3736_v41  ;;  %v3773_v29 = vsub.f32 %v859_v1, %v3749_v38 }
 0x1c2   :  { %1668 = vmatpush.msra.mxu1 %v1667_v13  ;;  %1730 = vmatpush.msra.mxu2 %v3603_v47  ;;  %v1685_v13 = vand.u32 4294901760, %v1684_v55  ;;  %v1691_v34 = vand.u32 4294901760, %v1690_v17  ;;  %v4090_v55 = vand.u32 4294901760, %v3702_v59  ;;  %v3724_v17 = vsub.f32 %v867_v33, %v3706_v44  ;;  %v857_v33 = vld [vmem:[#allocation8 + $0x178] sm:$0xff] }
 0x1c3   :  { %1571 = vmatpush.msra.mxu0 %v3535_v40  ;;  %1771 = vmatpush.msra.mxu3 %v3568_v53  ;;  %v1942_v8 = vand.u32 4294901760, %v1941_v50  ;;  %v3762_v36 = vand.u32 4294901760, %v857_v33 }
 0x1c4   :  { %1674 = vmatpush.msra.mxu1 %v1673_v19  ;;  %1733 = vmatpush.msra.mxu2 %v3615_v4  ;;  %v3710_v19 = vand.u32 4294901760, %v865_v31  ;;  %4163 = vst [vmem:[#allocation20_spill] sm:$0xff] %v3724_v17 }
 0x1c5   :  { %1573 = vmatpush.msra.mxu0 %v3554_v42  ;;  %1773 = vmatpush.msra.mxu3 %v3581_v61  ;;  %v3785_v1 = vsub.f32 %v857_v33, %v3762_v36 }
 0x1c6   :  { %1680 = vmatpush.msra.mxu1 %v1679_v56  ;;  %1736 = vmatpush.msra.mxu2 %v3627_v16  ;;  %v3719_v56 = vand.u32 4294901760, %v863_v35 }
 0x1c7   :  { %1575 = vmatpush.msra.mxu0 %v3568_v53  ;;  %1775 = vmatpush.msra.mxu3 %v3593_v7 }
 0x1c8   :  { %1686 = vmatpush.msra.mxu1 %v1685_v13  ;;  %1739 = vmatpush.msra.mxu2 %v3639_v51  ;;  %v3731_v13 = vsub.f32 %v865_v31, %v3710_v19  ;;  %v3744_v31 = vsub.f32 %v863_v35, %v3719_v56 }
 0x1c9   :  { %1577 = vmatpush.msra.mxu0 %v3581_v61  ;;  %1777 = vmatpush.msra.mxu3 %v3605_v49 }
 0x1ca   :  { %1692 = vmatpush.msra.mxu1 %v1691_v34  ;;  %1742 = vmatpush.msra.mxu2 %v3651_v62  ;;  %4164 = vst [vmem:[#allocation21_spill] sm:$0xff] %v3731_v13  ;;  %v1947_v34 = vsub.f32 %v3702_v59, %v4090_v55  ;;  %v855_v55 = vld [vmem:[#allocation8 + $0x168] sm:$0xff] }
 0x1cb   :  { %1579 = vmatpush.msra.mxu0 %v3593_v7  ;;  %1779 = vmatpush.msra.mxu3 %v3617_v30  ;;  %4165 = vst [vmem:[#allocation22_spill] sm:$0xff] %v3744_v31  ;;  %v3775_v26 = vand.u32 4294901760, %v855_v55 }
 0x1cc   :  { %1694 = vmatmul.f32.vlgmr.msra.gmra.mxu1 %v3399_v48  ;;  %1745 = vmatpush.msra.mxu2 %v3661_v27  ;;  %v851_v27 = vld [vmem:[#allocation8 + $0x148] sm:$0xff] }
 0x1cd   :  { %1861 = vmatpush.msrb.mxu1 %v3461_v3  ;;  %1581 = vmatpush.msra.mxu0 %v3605_v49  ;;  %v4166_v3 = vand.u32 4294901760, %v3715_v15  ;;  %v3797_v33 = vsub.f32 %v855_v55, %v3775_v26 }
 0x1ce   :  { %1781 = vmatpush.msra.mxu3 %v3629_v57  ;;  %1748 = vmatmul.f32.vlgmr.msra.gmra.mxu2 %v3407_v10  ;;  %v1948_v10 = vand.u32 4294901760, %v1947_v34  ;;  %v4168_v34 = vand.u32 4294901760, %v3731_v13 }
 0x1cf   :  { %1863 = vmatpush.msrb.mxu1 %v3468_v54  ;;  %1898 = vmatpush.msrb.mxu2 %v3677_v46  ;;  %v1953_v35 = vsub.f32 %v3715_v15, %v4166_v3  ;;  %v4167_v54 = vand.u32 4294901760, %v3724_v17 }
 0x1d0   :  { %1583 = vmatpush.msra.mxu0 %v3617_v30  ;;  %1783 = vmatpush.msra.mxu3 %v3641_v25  ;;  %v1965_v50 = vsub.f32 %v3731_v13, %v4168_v34  ;;  %v849_v13 = vld [vmem:[#allocation8 + $0x138] sm:$0xff] }
 0x1d1   :  { %1787 = vmatmul.f32.vlgmr.msra.gmra.mxu3 %v3416_v14  ;;  %1865 = vmatpush.msrb.mxu1 %v3478_v18  ;;  %v1959_v3 = vsub.f32 %v3724_v17, %v4167_v54  ;;  %v1954_v14 = vand.u32 4294901760, %v1953_v35  ;;  %v3787_v54 = vand.u32 4294901760, %v853_v63  ;;  %v3799_v18 = vand.u32 4294901760, %v851_v27  ;;  %v847_v17 = vld [vmem:[#allocation8 + $0x128] sm:$0xff]  ;;  %v845_v35 = vld [vmem:[#allocation8 + $0x118] sm:$0xff] }
 0x1d2   :  { %1900 = vmatpush.msrb.mxu2 %v3685_v32  ;;  %1943 = vmatpush.msrb.mxu3 %v1942_v8  ;;  %v4169_v8 = vand.u32 4294901760, %v3744_v31 }
 0x1d3   :  { %1585 = vmatpush.msra.mxu0 %v3629_v57  ;;  %1867 = vmatpush.msrb.mxu1 %v3488_v6  ;;  %v1960_v6 = vand.u32 4294901760, %v1959_v3  ;;  %v3810_v55 = vsub.f32 %v853_v63, %v3787_v54  ;;  %v3823_v63 = vsub.f32 %v851_v27, %v3799_v18 }
 0x1d4   :  { %1902 = vmatpush.msrb.mxu2 %v3698_v24  ;;  %1949 = vmatpush.msrb.mxu3 %v1948_v10  ;;  %v1971_v34 = vsub.f32 %v3744_v31, %v4169_v8  ;;  %v1966_v10 = vand.u32 4294901760, %v1965_v50  ;;  %v4170_v8 = vand.u32 4294901760, %v3476_v5  ;;  %v3812_v31 = vand.u32 4294901760, %v849_v13 }
 0x1d5   :  { %1587 = vmatpush.msra.mxu0 %v3641_v25  ;;  %1869 = vmatpush.msrb.mxu1 %v3499_v60  ;;  %v4171_v60 = vand.u32 4294901760, %v3760_v12  ;;  %v4172_v5 = vand.u32 4294901760, %v3486_v37  ;;  %v4173_v50 = vand.u32 4294901760, %v3773_v29  ;;  %v4174_v37 = vand.u32 4294901760, %v3497_v58 }
 0x1d6   :  { %1593 = vmatmul.f32.vlgmr.msra.gmra.mxu0 %v3433_v45  ;;  %1904 = vmatpush.msrb.mxu2 %v3706_v44  ;;  %v1972_v45 = vand.u32 4294901760, %v1971_v34  ;;  %v4175_v34 = vand.u32 4294901760, %v3785_v1  ;;  %v3836_v27 = vsub.f32 %v849_v13, %v3812_v31  ;;  %v4176_v58 = vand.u32 4294901760, %v3508_v9 }
 0x1d7   :  { %1794 = vmatpush.msrb.mxu0 %v4170_v8  ;;  %1955 = vmatpush.msrb.mxu3 %v1954_v14  ;;  %v1977_v3 = vsub.f32 %v3760_v12, %v4171_v60  ;;  %v1983_v14 = vsub.f32 %v3773_v29, %v4173_v50  ;;  %v1994_v8 = vand.u32 4294901760, %v3797_v33  ;;  %v3825_v60 = vand.u32 4294901760, %v847_v17  ;;  %v843_v50 = vld [vmem:[#allocation8 + $0x108] sm:$0xff] }
 0x1d8   :  { %1871 = vmatpush.msrb.mxu1 %v3512_v43  ;;  %1906 = vmatpush.msrb.mxu2 %v3710_v19  ;;  %v4177_v9 = vand.u32 4294901760, %v3522_v2 }
 0x1d9   :  { %1798 = vmatpush.msrb.mxu0 %v4172_v5  ;;  %1961 = vmatpush.msrb.mxu3 %v1960_v6  ;;  %v1978_v43 = vand.u32 4294901760, %v1977_v3  ;;  %v1989_v6 = vsub.f32 %v3785_v1, %v4175_v34  ;;  %v2000_v5 = vand.u32 4294901760, %v3810_v55  ;;  %v1995_v3 = vsub.f32 %v3797_v33, %v1994_v8 }
 0x1da   :  { %1873 = vmatpush.msrb.mxu1 %v3524_v23  ;;  %1908 = vmatpush.msrb.mxu2 %v3719_v56  ;;  %v3840_v23 = vand.u32 4294901760, %v845_v35  ;;  %v3849_v13 = vsub.f32 %v847_v17, %v3825_v60  ;;  %v2012_v34 = vand.u32 4294901760, %v3836_v27  ;;  %v4178_v17 = vand.u32 4294901760, %v3540_v20 }
 0x1db   :  { %1802 = vmatpush.msrb.mxu0 %v4174_v37  ;;  %1967 = vmatpush.msrb.mxu3 %v1966_v10  ;;  %v1984_v10 = vand.u32 4294901760, %v1983_v14  ;;  %v2006_v37 = vand.u32 4294901760, %v3823_v63  ;;  %v2001_v14 = vsub.f32 %v3810_v55, %v2000_v5  ;;  %v1996_v2 = vand.u32 4294901760, %v1995_v3 }
 0x1dc   :  { %1875 = vmatpush.msrb.mxu1 %v3535_v40  ;;  %1910 = vmatpush.msrb.mxu2 %v3736_v41  ;;  %v3853_v40 = vand.u32 4294901760, %v843_v50 }
 0x1dd   :  { %1806 = vmatpush.msrb.mxu0 %v4176_v58  ;;  %1973 = vmatpush.msrb.mxu3 %v1972_v45  ;;  %v1990_v45 = vand.u32 4294901760, %v1989_v6  ;;  %v2018_v6 = vand.u32 4294901760, %v3849_v13  ;;  %v2002_v20 = vand.u32 4294901760, %v2001_v14  ;;  %v2013_v58 = vsub.f32 %v3836_v27, %v2012_v34 }
 0x1de   :  { %1877 = vmatpush.msrb.mxu1 %v3554_v42  ;;  %1912 = vmatpush.msrb.mxu2 %v3749_v38  ;;  %v3864_v42 = vsub.f32 %v845_v35, %v3840_v23  ;;  %v4179_v35 = vand.u32 4294901760, %v3550_v11  ;;  %v4184_v14 = vand.u32 4294901760, %v3615_v4  ;;  %v4187_v4 = vand.u32 4294901760, %v3639_v51  ;;  %v4191_v51 = vld [vmem:[#allocation19_spill] sm:$0xff] }
 0x1df   :  { %1810 = vmatpush.msrb.mxu0 %v4177_v9  ;;  %1979 = vmatpush.msrb.mxu3 %v1978_v43  ;;  %v2007_v43 = vsub.f32 %v3823_v63, %v2006_v37  ;;  %v2019_v11 = vsub.f32 %v3849_v13, %v2018_v6  ;;  %v2014_v9 = vand.u32 4294901760, %v2013_v58 }
 0x1e0   :  { %1879 = vmatpush.msrb.mxu1 %v3568_v53  ;;  %1914 = vmatpush.msrb.mxu2 %v3762_v36  ;;  %v3875_v53 = vsub.f32 %v843_v50, %v3853_v40 }
 0x1e1   :  { %1814 = vmatpush.msrb.mxu0 %v4178_v17  ;;  %1985 = vmatpush.msrb.mxu3 %v1984_v10  ;;  %v4180_v10 = vand.u32 4294901760, %v3563_v52  ;;  %v2008_v50 = vand.u32 4294901760, %v2007_v43  ;;  %v4188_v17 = vand.u32 4294901760, %v3702_v59  ;;  %v4193_v43 = vld [vmem:[#allocation20_spill] sm:$0xff] }
 0x1e2   :  { %1881 = vmatpush.msrb.mxu1 %v3581_v61  ;;  %1916 = vmatpush.msrb.mxu2 %v3775_v26  ;;  %v2024_v61 = vand.u32 4294901760, %v3864_v42  ;;  %v2030_v3 = vand.u32 4294901760, %v3875_v53 }
 0x1e3   :  { %1818 = vmatpush.msrb.mxu0 %v4179_v35  ;;  %1991 = vmatpush.msrb.mxu3 %v1990_v45  ;;  %v4182_v45 = vand.u32 4294901760, %v3591_v0  ;;  %v4194_v35 = vand.u32 4294901760, %v4193_v43 }
 0x1e4   :  { %1883 = vmatpush.msrb.mxu1 %v3593_v7  ;;  %1918 = vmatpush.msrb.mxu2 %v3787_v54  ;;  %v4181_v7 = vand.u32 4294901760, %v3579_v28  ;;  %v2025_v52 = vsub.f32 %v3864_v42, %v2024_v61  ;;  %v2031_v28 = vsub.f32 %v3875_v53, %v2030_v3 }
 0x1e5   :  { %1822 = vmatpush.msrb.mxu0 %v4180_v10  ;;  %1997 = vmatpush.msrb.mxu3 %v1996_v2  ;;  %v4192_v2 = vand.u32 4294901760, %v4191_v51 }
 0x1e6   :  { %1885 = vmatpush.msrb.mxu1 %v3605_v49  ;;  %1920 = vmatpush.msrb.mxu2 %v3799_v18  ;;  %v2020_v49 = vand.u32 4294901760, %v2019_v11  ;;  %v2026_v0 = vand.u32 4294901760, %v2025_v52 }
 0x1e7   :  { %1826 = vmatpush.msrb.mxu0 %v4181_v7  ;;  %2003 = vmatpush.msrb.mxu3 %v2002_v20 }
 0x1e8   :  { %1887 = vmatpush.msrb.mxu1 %v3617_v30  ;;  %1922 = vmatpush.msrb.mxu2 %v3812_v31  ;;  %v4183_v30 = vand.u32 4294901760, %v3603_v47  ;;  %v4185_v47 = vand.u32 4294901760, %v3627_v16  ;;  %v4190_v16 = vand.u32 4294901760, %v3715_v15 }
 0x1e9   :  { %1830 = vmatpush.msrb.mxu0 %v4182_v45  ;;  %2009 = vmatpush.msrb.mxu3 %v2008_v50 }
 0x1ea   :  { %1889 = vmatpush.msrb.mxu1 %v3629_v57  ;;  %1924 = vmatpush.msrb.mxu2 %v3825_v60  ;;  %v2032_v57 = vand.u32 4294901760, %v2031_v28 }
 0x1eb   :  { %1834 = vmatpush.msrb.mxu0 %v4183_v30  ;;  %2015 = vmatpush.msrb.mxu3 %v2014_v9 }
 0x1ec   :  { %1891 = vmatpush.msrb.mxu1 %v3641_v25  ;;  %1926 = vmatpush.msrb.mxu2 %v3840_v23  ;;  %v4186_v25 = vand.u32 4294901760, %v3694_v39 }
 0x1ed   :  { %1838 = vmatpush.msrb.mxu0 %v4184_v14  ;;  %2021 = vmatpush.msrb.mxu3 %v2020_v49 }
 0x1ee   :  { %1893 = vmatmul.f32.vlgmr.msrb.gmra.mxu1 %v3399_v48  ;;  %1928 = vmatpush.msrb.mxu2 %v3853_v40 }
 0x1ef   :  { %2094 = vmatpush.msra.mxu1 %v3677_v46  ;;  %1842 = vmatpush.msrb.mxu0 %v4185_v47 }
 0x1f0   :  { %2027 = vmatpush.msrb.mxu3 %v2026_v0  ;;  %1934 = vmatmul.f32.vlgmr.msrb.gmra.mxu2 %v3442_v22  ;;  %v4189_v22 = vand.u32 4294901760, %v3651_v62 }
 0x1f1   :  { %2096 = vmatpush.msra.mxu1 %v3685_v32  ;;  %2135 = vmatpush.msra.mxu2 %v4186_v25 }
 0x1f2   :  { %1846 = vmatpush.msrb.mxu0 %v4187_v4  ;;  %2033 = vmatpush.msrb.mxu3 %v2032_v57 }
 0x1f3   :  { %2035 = vmatmul.f32.vlgmr.msrb.gmra.mxu3 %v3402_v21  ;;  %2098 = vmatpush.msra.mxu1 %v3698_v24 }
 0x1f4   :  { %2139 = vmatpush.msra.mxu2 %v4188_v17  ;;  %2202 = vmatpush.msra.mxu3 %v3677_v46  ;;  %v4195_v46 = vld [vmem:[#allocation21_spill] sm:$0xff] }
 0x1f5   :  { %1850 = vmatpush.msrb.mxu0 %v4189_v22  ;;  %2100 = vmatpush.msra.mxu1 %v3706_v44  ;;  %v4196_v62 = vand.u32 4294901760, %v4195_v46 }
 0x1f6   :  { %2143 = vmatpush.msra.mxu2 %v4190_v16  ;;  %2204 = vmatpush.msra.mxu3 %v3685_v32  ;;  %v4197_v32 = vld [vmem:[#allocation22_spill] sm:$0xff] }
 0x1f7   :  { %1854 = vmatpush.msrb.mxu0 %v4192_v2  ;;  %2102 = vmatpush.msra.mxu1 %v3710_v19 }
 0x1f8   :  { %1856 = vmatmul.f32.vlgmr.msrb.gmra.mxu0 %v3399_v48  ;;  %2147 = vmatpush.msra.mxu2 %v4194_v35  ;;  %v4198_v48 = vand.u32 4294901760, %v4197_v32 }
 0x1f9   :  { %2041 = vmatpush.msra.mxu0 %v3694_v39  ;;  %2206 = vmatpush.msra.mxu3 %v3698_v24  ;;  %v4199_v24 = vand.u32 4294901760, %v3760_v12  ;;  %v4200_v39 = vand.u32 4294901760, %v3773_v29 }
 0x1fa   :  { %2104 = vmatpush.msra.mxu1 %v3719_v56  ;;  %2151 = vmatpush.msra.mxu2 %v4196_v62 }
 0x1fb   :  { %2044 = vmatpush.msra.mxu0 %v3702_v59  ;;  %2208 = vmatpush.msra.mxu3 %v3706_v44  ;;  %v4201_v59 = vand.u32 4294901760, %v3785_v1 }
 0x1fc   :  { %2106 = vmatpush.msra.mxu1 %v3736_v41  ;;  %2155 = vmatpush.msra.mxu2 %v4198_v48 }
 0x1fd   :  { %2047 = vmatpush.msra.mxu0 %v3715_v15  ;;  %2210 = vmatpush.msra.mxu3 %v3710_v19 }
 0x1fe   :  { %2108 = vmatpush.msra.mxu1 %v3749_v38  ;;  %2159 = vmatpush.msra.mxu2 %v4199_v24 }
 0x1ff   :  { %2050 = vmatpush.msra.mxu0 %v4193_v43  ;;  %2212 = vmatpush.msra.mxu3 %v3719_v56 }
 0x200   :  { %2110 = vmatpush.msra.mxu1 %v3762_v36  ;;  %2163 = vmatpush.msra.mxu2 %v4200_v39 }
 0x201   :  { %2053 = vmatpush.msra.mxu0 %v4195_v46  ;;  %2214 = vmatpush.msra.mxu3 %v3736_v41 }
 0x202   :  { %2112 = vmatpush.msra.mxu1 %v3775_v26  ;;  %2167 = vmatpush.msra.mxu2 %v4201_v59 }
 0x203   :  { %2056 = vmatpush.msra.mxu0 %v4197_v32  ;;  %2216 = vmatpush.msra.mxu3 %v3749_v38 }
 0x204   :  { %2114 = vmatpush.msra.mxu1 %v3787_v54  ;;  %2171 = vmatpush.msra.mxu2 %v1994_v8  ;;  %v1013_v38 = vpop.f32.mrf.mxu1 }
 0x205   :  { %2059 = vmatpush.msra.mxu0 %v3760_v12  ;;  %2218 = vmatpush.msra.mxu3 %v3762_v36  ;;  %v4202_v36 = vld [vmem:[#allocation17_spill] sm:$0xff] }
 0x206   :  { %2116 = vmatpush.msra.mxu1 %v3799_v18  ;;  %2175 = vmatpush.msra.mxu2 %v2000_v5 }
 0x207   :  { %2062 = vmatpush.msra.mxu0 %v3773_v29  ;;  %2220 = vmatpush.msra.mxu3 %v3775_v26  ;;  %v4203_v26 = vld [vmem:[#allocation16_spill] sm:$0xff] }
 0x208   :  { %2118 = vmatpush.msra.mxu1 %v3812_v31  ;;  %2179 = vmatpush.msra.mxu2 %v2006_v37 }
 0x209   :  { %2065 = vmatpush.msra.mxu0 %v3785_v1  ;;  %2222 = vmatpush.msra.mxu3 %v3787_v54 }
 0x20a   :  { %2120 = vmatpush.msra.mxu1 %v3825_v60  ;;  %2183 = vmatpush.msra.mxu2 %v2012_v34 }
 0x20b   :  { %2068 = vmatpush.msra.mxu0 %v3797_v33  ;;  %2224 = vmatpush.msra.mxu3 %v3799_v18 }
 0x20c   :  { %2122 = vmatpush.msra.mxu1 %v3840_v23  ;;  %2187 = vmatpush.msra.mxu2 %v2018_v6  ;;  %v912_v41 = vpop.f32.mrf.mxu0  ;;  %v1067_v12 = vpop.f32.mrf.mxu2 }
 0x20d   :  { %2071 = vmatpush.msra.mxu0 %v3810_v55  ;;  %2226 = vmatpush.msra.mxu3 %v3812_v31  ;;  %v1014_v44 = vadd.f32 %v1013_v38, %v912_v41  ;;  %v1212_v56 = vpop.f32.mrf.mxu1 }
 0x20e   :  { %2124 = vmatpush.msra.mxu1 %v3853_v40  ;;  %2191 = vmatpush.msra.mxu2 %v2024_v61  ;;  %v1106_v19 = vpop.f32.mrf.mxu3 }
 0x20f   :  { %2074 = vmatpush.msra.mxu0 %v3823_v63  ;;  %2228 = vmatpush.msra.mxu3 %v3825_v60  ;;  %v1068_v31 = vadd.f32 %v1067_v12, %v1014_v44  ;;  %v4204_v12 = vld [vmem:[#allocation18_spill] sm:$0xff] }
 0x210   :  { %2128 = vmatmul.f32.vlgmr.msra.gmra.mxu1 %v4202_v36  ;;  %2195 = vmatpush.msra.mxu2 %v2030_v3 }
 0x211   :  { %2077 = vmatpush.msra.mxu0 %v3836_v27  ;;  %2230 = vmatpush.msra.mxu3 %v3840_v23  ;;  %v1107_v18 = vadd.f32 %v1106_v19, %v1068_v31  ;;  %v4205_v19 = vld [vmem:[#allocation15_spill] sm:$0xff] }
 0x212   :  { %2197 = vmatmul.f32.vlgmr.msra.gmra.mxu2 %v3402_v21 }
 0x213   :  { %2080 = vmatpush.msra.mxu0 %v3849_v13  ;;  %2232 = vmatpush.msra.mxu3 %v3853_v40 }
 0x214   :  { %2234 = vmatmul.f32.vlgmr.msra.gmra.mxu3 %v3402_v21 }
 0x215   :  { %2083 = vmatpush.msra.mxu0 %v3864_v42  ;;  %v1253_v29 = vpop.f32.mrf.mxu2 }
 0x216   :  { %v1175_v15 = vpop.f32.mrf.mxu0 }
 0x217   :  { %2086 = vmatpush.msra.mxu0 %v3875_v53  ;;  %v1176_v54 = vadd.f32 %v1175_v15, %v1107_v18 }
 0x218   :  { %2089 = vmatmul.f32.vlgmr.msra.gmra.mxu0 %v4203_v26  ;;  %v1354_v33 = vpop.f32.mrf.mxu3 }
 0x219   :  { %v1213_v55 = vadd.f32 %v1212_v56, %v1176_v54 }
 0x21b   :  { %v1254_v60 = vadd.f32 %v1253_v29, %v1213_v55 }
 0x21d   :  { %v1355_v37 = vadd.f32 %v1354_v33, %v1254_v60 }
 0x227   :  { %v1447_v21 = vpop.f32.mrf.mxu1 }
 0x22f   :  { %v1516_v8 = vpop.f32.mrf.mxu2 }
 0x231   :  { %v1408_v1 = vpop.f32.mrf.mxu0 }
 0x232   :  { %v1553_v5 = vpop.f32.mrf.mxu3  ;;  %v1409_v40 = vadd.f32 %v1408_v1, %v1355_v37 }
 0x234   :  { %v1448_v53 = vadd.f32 %v1447_v21, %v1409_v40 }
 0x236   :  { %v1517_v61 = vadd.f32 %v1516_v8, %v1448_v53 }
 0x238   :  { %v1554_v11 = vadd.f32 %v1553_v5, %v1517_v61 }
 0x23a   :  { %2304 = vrcp.f32 %v1554_v11  ;;  %vm2243_vm2 = vweird.f32 %v1554_v11  ;;  %v2249_v35 = vand.u32 2147483648, %v1554_v11  ;;  %v2247_v48 = vand.u32 2147483647, %v1554_v11 }
 0x23c   :  { %v2250_v59 = vor.u32 1.1754944e-38, %v2249_v35  ;;  %vm2248_vm7 = vcmp.eq.f32.partialorder %v2247_v48, 8.507059e+37 }
 0x240   :  { %v2305_v30 = vpop.eup %2304 }
 0x241   :  { %v2239_v47 = vmul.f32 %v2305_v30, %v1554_v11  ;;  %vm2244_vm1 = vweird.f32 %v2305_v30 }
 0x242   :  { %vm2245_vm4 = vmor %vm2243_vm2, %vm2244_vm1 }
 0x243   :  { %v2240_v17 = vsub.f32 1.0, %v2239_v47 }
 0x245   :  { %v2241_v22 = vmul.f32 %v2305_v30, %v2240_v17 }
 0x247   :  { %v2242_v43 = vadd.f32 %v2305_v30, %v2241_v22 }
 0x249   :  { %v1695_v27 = vpop.f32.mrf.mxu1  ;;  %v2246_v24 = vsel %vm2245_vm4, %v2305_v30, %v2242_v43 }
 0x24a   :  { %v2251_v41 = vsel %vm2248_vm7, %v2250_v59, %v2246_v24 }
 0x24b   :  { %v2252_v15 = vmul.f32 %v4205_v19, %v2251_v41 }
 0x251   :  { %v1749_v13 = vpop.f32.mrf.mxu2 }
 0x253   :  { %v1594_v63 = vpop.f32.mrf.mxu0 }
 0x254   :  { %v1696_v23 = vadd.f32 %v1695_v27, %v1594_v63  ;;  %v1788_v42 = vpop.f32.mrf.mxu3 }
 0x256   :  { %v1750_v34 = vadd.f32 %v1749_v13, %v1696_v23 }
 0x258   :  { %v1789_v20 = vadd.f32 %v1788_v42, %v1750_v34 }
 0x26b   :  { %v1894_v10 = vpop.f32.mrf.mxu1 }
 0x273   :  { %v1935_v3 = vpop.f32.mrf.mxu2 }
 0x275   :  { %v1857_v6 = vpop.f32.mrf.mxu0 }
 0x276   :  { %v1858_v58 = vadd.f32 %v1857_v6, %v1789_v20  ;;  %v2036_v9 = vpop.f32.mrf.mxu3 }
 0x278   :  { %v1895_v50 = vadd.f32 %v1894_v10, %v1858_v58 }
 0x27a   :  { %v1936_v7 = vadd.f32 %v1935_v3, %v1895_v50 }
 0x27c   :  { %v2037_v52 = vadd.f32 %v2036_v9, %v1936_v7 }
 0x28d   :  { %v2129_v28 = vpop.f32.mrf.mxu1 }
 0x295   :  { %v2090_v45 = vpop.f32.mrf.mxu0  ;;  %v2198_v14 = vpop.f32.mrf.mxu2 }
 0x296   :  { %v2091_v49 = vadd.f32 %v2090_v45, %v2037_v52 }
 0x297   :  { %v2235_v25 = vpop.f32.mrf.mxu3 }
 0x298   :  { %v2130_v0 = vadd.f32 %v2129_v28, %v2091_v49 }
 0x29a   :  { %v2199_v57 = vadd.f32 %v2198_v14, %v2130_v0 }
 0x29c   :  { %v2236_v4 = vadd.f32 %v2235_v25, %v2199_v57 }
 0x29e   :  { %2306 = vrcp.f32 %v2236_v4  ;;  %v2264_v46 = vand.u32 2147483648, %v2236_v4  ;;  %v2262_v32 = vand.u32 2147483647, %v2236_v4  ;;  %vm2258_vm5 = vweird.f32 %v2236_v4 }
 0x2a0   :  { %v2265_v36 = vor.u32 1.1754944e-38, %v2264_v46  ;;  %vm2263_vm8 = vcmp.eq.f32.partialorder %v2262_v32, 8.507059e+37 }
 0x2a4   :  { %v2307_v16 = vpop.eup %2306 }
 0x2a5   :  { %v2254_v51 = vmul.f32 %v2307_v16, %v2236_v4  ;;  %vm2259_vm3 = vweird.f32 %v2307_v16 }
 0x2a6   :  { %vm2260_vm6 = vmor %vm2258_vm5, %vm2259_vm3 }
 0x2a7   :  { %v2255_v2 = vsub.f32 1.0, %v2254_v51 }
 0x2a9   :  { %v2256_v62 = vmul.f32 %v2307_v16, %v2255_v2 }
 0x2ab   :  { %v2257_v39 = vadd.f32 %v2307_v16, %v2256_v62 }
 0x2ad   :  { %v2261_v26 = vsel %vm2260_vm6, %v2307_v16, %v2257_v39 }
 0x2ae   :  { %v2266_v38 = vsel %vm2263_vm8, %v2265_v36, %v2261_v26 }
 0x2af   :  { %v2267_v44 = vmul.f32 %v4204_v12, %v2266_v38 }
 0x2b1   :  { %v2270_v56 = vrot.slane %v2267_v44, 6 }
 0x2b3   :  { %v2271_v31 = vsel %vm798_vm0, %v2252_v15, %v2270_v56 }
 0x2b4   :  { %2273 = vst [vmem:[#allocation10] sm:$0xf] %v2271_v31 }
 0x2b5   :  { %2284 = dma.vmem_to_hbm [thread:$0]  %s2280_s3, 64, %s2282_s11, [#allocation4]  }
 0x2b6   :  { %2434 = dma.done.wait [#allocation4], 64  }
 0x2b7   :  { %2435 = vsyncadd [#allocation4], 4294967232 }
 0x2b8   :  { %2289 = vsyncpa [#allocation3], 1 }
 0x2b9   :  { %2290 = vsyncpa [#allocation6], 1 }
 0x2ba   :  { %2291 = vsyncpa [#allocation9], 1 }
 0x2bb   :  { %2292 = vsyncpa [#allocation4], 1 }

</bundles_post_ra>
